<compile_context>
chip_gen: v7x
topology: tpu7x:2x2x1
jax: 0.10.0
libtpu: 0.0.40
codegen_flags: <defaults>
</compile_context>

<pallas_src>
import functools

import jax
import jax.numpy as jnp
from jax.experimental import pallas as pl
from jax.experimental.pallas import tpu as pltpu


def _round_up(x: int, m: int) -> int:
    return (x + m - 1) // m * m


def decoder_kernel(y_ref, ehp_ref, enc_ref, h0_ref, c0_ref,
                   w_gates_ref, bias_ref, w_comb_ref, out_ref,
                   *, num_steps, hidden_pad):
    Hp = hidden_pad

    # Loop-invariant operands: read from VMEM once, reused across all T steps.
    ehp = ehp_ref[...]          # (Bc, S, Hp)        att_projection(enc_hiddens)
    enc = enc_ref[...]          # (Bc, S, 2*Hp)
    w_g = w_gates_ref[...]      # (Ep + 2*Hp, 4*Hp)  pre-transposed fused [W_ih | W_hh]
    w_c = w_comb_ref[...]       # (3*Hp, Hp)         pre-transposed combined projection
    bias = bias_ref[...]        # (1, 4*Hp)          b_ih + b_hh (f32)
    cdt = w_g.dtype             # compute dtype (f32 or bf16); accumulation is f32

    def step(t, carry):
        h_prev, c_prev, o_prev = carry                      # f32 (Bc, Hp) each

        # --- LSTMCell: ONE fused gate matmul on [Y_t ; o_prev ; h_prev] ---
        y_t = y_ref[t]                                      # (Bc, Ep)
        x = jnp.concatenate(
            [y_t, o_prev.astype(cdt), h_prev.astype(cdt)], axis=-1)
        gates = jnp.dot(x, w_g, preferred_element_type=jnp.float32) + bias
        i_g = jax.nn.sigmoid(gates[:, 0 * Hp:1 * Hp])       # 128-lane aligned slices
        f_g = jax.nn.sigmoid(gates[:, 1 * Hp:2 * Hp])
        g_g = jnp.tanh(gates[:, 2 * Hp:3 * Hp])
        o_g = jax.nn.sigmoid(gates[:, 3 * Hp:4 * Hp])
        c_new = f_g * c_prev + i_g * g_g
        h_new = o_g * jnp.tanh(c_new)                       # (Bc, Hp) f32

        # --- Attention: bmm on the MXU (e_t = ehp @ h ; a_t = alpha @ enc) ---
        h3 = h_new.astype(cdt)[:, None, :]                  # (Bc, 1, Hp)
        e_t = jnp.einsum('bqh,bsh->bqs', h3, ehp,
                         preferred_element_type=jnp.float32)     # (Bc, 1, S)
        e_t = e_t - jnp.max(e_t, axis=-1, keepdims=True)
        p = jnp.exp(e_t)
        inv = pl.reciprocal(jnp.sum(p, axis=-1, keepdims=True), approx=True)
        alpha = (p * inv).astype(cdt)                        # softmax over src positions
        a_t = jnp.einsum('bqs,bsk->bqk', alpha, enc,
                         preferred_element_type=jnp.float32)     # (Bc, 1, 2*Hp)

        # --- Combined output projection (single fused matmul) + tanh ---
        u = jnp.concatenate([h_new, a_t[:, 0, :]], axis=-1).astype(cdt)   # (Bc, 3*Hp)
        o_t = jnp.tanh(jnp.dot(u, w_c, preferred_element_type=jnp.float32))
        # TODO(synk): dropout omitted - eval-mode semantics (identity); training-mode
        #             dropout not modeled.

        out_ref[t] = o_t
        return h_new, c_new, o_t

    h0 = h0_ref[...]
    c0 = c0_ref[...]
    o0 = jnp.zeros_like(h0)
    jax.lax.fori_loop(0, num_steps, step, (h0, c0, o0))


def decoder_forward(params, enc_hiddens, enc_masks, dec_init_state, target_padded,
                    *, compute_dtype=jnp.float32):
    """Mirrors Decoder.forward (eval mode). `enc_masks` is accepted for API parity but -
    exactly as in the reference step() - never applied to the attention scores.
    Set compute_dtype=jnp.bfloat16 on v6e/v7x at realistic H (f32 accumulation kept)."""
    del enc_masks
    H = params["hidden_size"]
    E = params["embed_size"]
    B, S, _ = enc_hiddens.shape

    Hp = _round_up(H, 128)
    Ep = _round_up(E, 128)
    # Megacore batch split: for B > 8 tile the batch over a "parallel" grid axis
    # (v7x's two TensorCores each take one block); otherwise a single block.
    if B > 8:
        Bp = _round_up(B, 16)
        Bc = Bp // 2
    else:
        Bp = _round_up(B, 8)
        Bc = Bp
    nb = Bp // Bc

    # --- glue (plain JAX/XLA): embedding gather + hoisted attention projection ---
    tgt = target_padded[:-1]                                     # (T, B)
    Y = jnp.take(params["embedding"], tgt, axis=0)               # (T, B, E)
    T = Y.shape[0]
    ehp = jnp.einsum("bsk,hk->bsh", enc_hiddens.astype(jnp.float32),
                     params["w_att"])                            # (B, S, H)

    h0, c0 = dec_init_state

    # --- fused, pre-transposed, per-block zero-padded weights ---
    def pad2(w, rows, cols):
        return jnp.pad(w, ((0, rows - w.shape[0]), (0, cols - w.shape[1])))

    def pad_gate_cols(w_t):   # (in, 4H) -> (in, 4*Hp): each gate block padded H -> Hp
        return jnp.concatenate(
            [pad2(w_t[:, g * H:(g + 1) * H], w_t.shape[0], Hp) for g in range(4)],
            axis=1)

    w_ih = params["w_ih"]                                        # (4H, E+H)
    w_hh = params["w_hh"]                                        # (4H, H)
    w_gates = jnp.concatenate([
        pad2(pad_gate_cols(w_ih[:, :E].T), Ep, 4 * Hp),          # Y_t rows
        pad2(pad_gate_cols(w_ih[:, E:].T), Hp, 4 * Hp),          # o_prev rows
        pad2(pad_gate_cols(w_hh.T),        Hp, 4 * Hp),          # h_prev rows
    ], axis=0).astype(compute_dtype)                             # (Ep+2Hp, 4Hp)

    b = params["b_ih"] + params["b_hh"]                          # (4H,)
    bias = jnp.concatenate(
        [jnp.pad(b[g * H:(g + 1) * H], (0, Hp - H)) for g in range(4)]
    ).reshape(1, 4 * Hp).astype(jnp.float32)

    w_comb_t = params["w_comb"].T                                # (3H, H)
    w_comb = jnp.concatenate([
        pad2(w_comb_t[:H, :], Hp, Hp),                           # h rows
        pad2(w_comb_t[H:, :], 2 * Hp, Hp),                       # a_t rows
    ], axis=0).astype(compute_dtype)                             # (3Hp, Hp)

    # --- zero-padded activations / states (padding is inert: padded weight
    #     rows/cols are zero and padded h/c columns stay zero) ---
    Y_p = jnp.pad(Y, ((0, 0), (0, Bp - B), (0, Ep - E))).astype(compute_dtype)
    ehp_p = jnp.pad(ehp, ((0, Bp - B), (0, 0), (0, Hp - H))).astype(compute_dtype)
    enc_p = jnp.pad(enc_hiddens,
                    ((0, Bp - B), (0, 0), (0, 2 * Hp - 2 * H))).astype(compute_dtype)
    h0_p = jnp.pad(h0, ((0, Bp - B), (0, Hp - H))).astype(jnp.float32)
    c0_p = jnp.pad(c0, ((0, Bp - B), (0, Hp - H))).astype(jnp.float32)

    grid_spec = pltpu.PrefetchScalarGridSpec(
        num_scalar_prefetch=0,
        grid=(nb,),
        in_specs=[
            pl.BlockSpec((T, Bc, Ep), lambda bb: (0, bb, 0)),        # Y (embedded tgt)
            pl.BlockSpec((Bc, S, Hp), lambda bb: (bb, 0, 0)),        # enc_hiddens_proj
            pl.BlockSpec((Bc, S, 2 * Hp), lambda bb: (bb, 0, 0)),    # enc_hiddens
            pl.BlockSpec((Bc, Hp), lambda bb: (bb, 0)),              # h0
            pl.BlockSpec((Bc, Hp), lambda bb: (bb, 0)),              # c0
            pl.BlockSpec((Ep + 2 * Hp, 4 * Hp), lambda bb: (0, 0)),  # fused gate weight
            pl.BlockSpec((1, 4 * Hp), lambda bb: (0, 0)),            # fused gate bias
            pl.BlockSpec((Hp + 2 * Hp, Hp), lambda bb: (0, 0)),      # fused comb weight
        ],
        out_specs=pl.BlockSpec((T, Bc, Hp), lambda bb: (0, bb, 0)),
    )

    kernel = functools.partial(decoder_kernel, num_steps=T, hidden_pad=Hp)
    out = pl.pallas_call(
        kernel,
        out_shape=jax.ShapeDtypeStruct((T, Bp, Hp), jnp.float32),
        grid_spec=grid_spec,
        compiler_params=pltpu.CompilerParams(
            dimension_semantics=("parallel",),         # batch blocks are independent
            vmem_limit_bytes=64 * 1024 * 1024,         # explicit budget (v7x has 64 MiB)
        ),
    )(Y_p, ehp_p, enc_p, h0_p, c0_p, w_gates, bias, w_comb)

    return out[:, :B, :H]


def decoder_forward_ref(params, enc_hiddens, enc_masks, dec_init_state, target_padded):
    """Pure-JAX reference that mirrors the PyTorch forward exactly (eval mode)."""
    del enc_masks
    H = params["hidden_size"]
    B = enc_hiddens.shape[0]
    tgt = target_padded[:-1]
    Y = jnp.take(params["embedding"], tgt, axis=0)
    ehp = jnp.einsum("bsk,hk->bsh", enc_hiddens, params["w_att"])
    h, c = dec_init_state
    o_prev = jnp.zeros((B, H), jnp.float32)
    outs = []
    for t in range(Y.shape[0]):
        ybar = jnp.concatenate([Y[t], o_prev], axis=-1)
        gates = (ybar @ params["w_ih"].T + params["b_ih"]
                 + h @ params["w_hh"].T + params["b_hh"])
        i_g = jax.nn.sigmoid(gates[:, 0 * H:1 * H])
        f_g = jax.nn.sigmoid(gates[:, 1 * H:2 * H])
        g_g = jnp.tanh(gates[:, 2 * H:3 * H])
        o_g = jax.nn.sigmoid(gates[:, 3 * H:4 * H])
        c = f_g * c + i_g * g_g
        h = o_g * jnp.tanh(c)
        e_t = jnp.einsum("bsh,bh->bs", ehp, h)
        alpha = jax.nn.softmax(e_t, axis=1)
        a_t = jnp.einsum("bs,bsk->bk", alpha, enc_hiddens)
        u_t = jnp.concatenate([h, a_t], axis=1)
        o_t = jnp.tanh(u_t @ params["w_comb"].T)
        outs.append(o_t)
        o_prev = o_t
    return jnp.stack(outs)


if __name__ == "__main__":
    # Small shapes: batch=4, src_len=8, hidden=32, embed=32, vocab=20, tgt_len=6 (=> T=5 steps).
    B, S, H, E, V, TGT_LEN = 4, 8, 32, 32, 20, 6

    key = jax.random.PRNGKey(0)
    ks = jax.random.split(key, 12)
    params = {
        "hidden_size": H,
        "embed_size": E,
        "embedding": jax.random.normal(ks[0], (V, E), jnp.float32) * 0.1,
        "w_att": jax.random.normal(ks[1], (H, 2 * H), jnp.float32) * 0.1,
        "w_ih": jax.random.normal(ks[2], (4 * H, E + H), jnp.float32) * 0.1,
        "w_hh": jax.random.normal(ks[3], (4 * H, H), jnp.float32) * 0.1,
        "b_ih": jax.random.normal(ks[4], (4 * H,), jnp.float32) * 0.1,
        "b_hh": jax.random.normal(ks[5], (4 * H,), jnp.float32) * 0.1,
        "w_comb": jax.random.normal(ks[6], (H, 3 * H), jnp.float32) * 0.1,
    }

    enc_hiddens = jax.random.normal(ks[7], (B, S, 2 * H), jnp.float32)
    enc_masks = jnp.zeros((B, S), jnp.float32)  # unused by the reference forward
    dec_init_state = (jax.random.normal(ks[8], (B, H), jnp.float32) * 0.1,
                      jax.random.normal(ks[9], (B, H), jnp.float32) * 0.1)
    target_padded = jax.random.randint(ks[10], (TGT_LEN, B), 0, V)

    out = decoder_forward(params, enc_hiddens, enc_masks, dec_init_state, target_padded)
    out = jax.block_until_ready(out)

    ref = decoder_forward_ref(params, enc_hiddens, enc_masks, dec_init_state, target_padded)
    ref = jax.block_until_ready(ref)

    assert out.shape == (TGT_LEN - 1, B, H), out.shape
    # Tolerance accounts for the EUP approximate-reciprocal softmax normalization
    # (pl.reciprocal(..., approx=True)); everything else is exact f32.
    assert jnp.allclose(out, ref, atol=5e-3, rtol=5e-3), float(jnp.max(jnp.abs(out - ref)))
    print("KERNEL_OK")
</pallas_src>

<mosaic_0001>
module attributes {stable_mosaic.version = 11 : i64} {
  func.func @decoder_kernel(%arg0: i32, %arg1: memref<5x8x128xf32, #tpu.memory_space<vmem>>, %arg2: memref<8x8x128xf32, #tpu.memory_space<vmem>>, %arg3: memref<8x8x256xf32, #tpu.memory_space<vmem>>, %arg4: memref<8x128xf32, #tpu.memory_space<vmem>>, %arg5: memref<8x128xf32, #tpu.memory_space<vmem>>, %arg6: memref<384x512xf32, #tpu.memory_space<vmem>>, %arg7: memref<1x512xf32, #tpu.memory_space<vmem>>, %arg8: memref<384x128xf32, #tpu.memory_space<vmem>>, %arg9: memref<5x8x128xf32, #tpu.memory_space<vmem>>) attributes {dimension_semantics = [#tpu.dimension_semantics<parallel>], iteration_bounds = array<i64: 1>, scalar_prefetch = 0 : i64, scratch_operands = 0 : i64, tpu.core_type = #tpu.core_type<tc>, window_params = [{transform_indices = @transform_0, window_bounds = array<i64: 5, 8, 128>}, {transform_indices = @transform_1, window_bounds = array<i64: 8, 8, 128>}, {transform_indices = @transform_2, window_bounds = array<i64: 8, 8, 256>}, {transform_indices = @transform_3, window_bounds = array<i64: 8, 128>}, {transform_indices = @transform_4, window_bounds = array<i64: 8, 128>}, {pipeline_mode = #tpu.pipeline_mode<synchronous>, transform_indices = @transform_5, window_bounds = array<i64: 384, 512>}, {pipeline_mode = #tpu.pipeline_mode<synchronous>, transform_indices = @transform_6, window_bounds = array<i64: 1, 512>}, {pipeline_mode = #tpu.pipeline_mode<synchronous>, transform_indices = @transform_7, window_bounds = array<i64: 384, 128>}, {transform_indices = @transform_8, window_bounds = array<i64: 5, 8, 128>}]} {
    %c0 = arith.constant 0 : index
    %c0_0 = arith.constant 0 : index
    %c0_1 = arith.constant 0 : index
    %0 = vector.load %arg2[%c0, %c0_0, %c0_1] : memref<8x8x128xf32, #tpu.memory_space<vmem>>, vector<8x8x128xf32>
    %c0_2 = arith.constant 0 : index
    %c0_3 = arith.constant 0 : index
    %c0_4 = arith.constant 0 : index
    %1 = vector.load %arg3[%c0_2, %c0_3, %c0_4] : memref<8x8x256xf32, #tpu.memory_space<vmem>>, vector<8x8x256xf32>
    %c0_5 = arith.constant 0 : index
    %c0_6 = arith.constant 0 : index
    %2 = vector.load %arg6[%c0_5, %c0_6] : memref<384x512xf32, #tpu.memory_space<vmem>>, vector<384x512xf32>
    %c0_7 = arith.constant 0 : index
    %c0_8 = arith.constant 0 : index
    %3 = vector.load %arg8[%c0_7, %c0_8] : memref<384x128xf32, #tpu.memory_space<vmem>>, vector<384x128xf32>
    %c0_9 = arith.constant 0 : index
    %c0_10 = arith.constant 0 : index
    %4 = vector.load %arg7[%c0_9, %c0_10] : memref<1x512xf32, #tpu.memory_space<vmem>>, vector<1x512xf32>
    %c0_11 = arith.constant 0 : index
    %c0_12 = arith.constant 0 : index
    %5 = vector.load %arg4[%c0_11, %c0_12] : memref<8x128xf32, #tpu.memory_space<vmem>>, vector<8x128xf32>
    %c0_13 = arith.constant 0 : index
    %c0_14 = arith.constant 0 : index
    %6 = vector.load %arg5[%c0_13, %c0_14] : memref<8x128xf32, #tpu.memory_space<vmem>>, vector<8x128xf32>
    %cst = arith.constant 0.000000e+00 : f32
    %7 = vector.broadcast %cst : f32 to vector<8x128xf32>
    %c0_i32 = arith.constant 0 : i32
    %c5_i32 = arith.constant 5 : i32
    %8 = arith.addi %c0_i32, %c5_i32 : i32
    %c1_i32 = arith.constant 1 : i32
    %9:3 = scf.for %arg10 = %c0_i32 to %8 step %c1_i32 iter_args(%arg11 = %5, %arg12 = %6, %arg13 = %7) -> (vector<8x128xf32>, vector<8x128xf32>, vector<8x128xf32>)  : i32 {
      %10 = arith.index_cast %arg10 : i32 to index
      %c0_16 = arith.constant 0 : index
      %c0_17 = arith.constant 0 : index
      %11 = vector.load %arg1[%10, %c0_16, %c0_17] : memref<5x8x128xf32, #tpu.memory_space<vmem>>, vector<1x8x128xf32>
      %12 = vector.shape_cast %11 : vector<1x8x128xf32> to vector<8x128xf32>
      %13 = tpu.concatenate %12, %arg13, %arg11 in 1 : vector<8x128xf32>, vector<8x128xf32>, vector<8x128xf32> -> vector<8x384xf32>
      %cst_18 = arith.constant dense<0.000000e+00> : vector<8x512xf32>
      %14 = tpu.matmul %13, %2, %cst_18 {dimension_numbers = #tpu.dot_dimension_numbers<[1], [0], [0], [1], [0, 0, 1, 1], [], []>} : vector<8x384xf32>, vector<384x512xf32>, vector<8x512xf32> -> vector<8x512xf32>
      %15 = vector.broadcast %4 : vector<1x512xf32> to vector<8x512xf32>
      %16 = arith.addf %14, %15 : vector<8x512xf32>
      %17 = vector.extract_strided_slice %16 {offsets = [0, 0], sizes = [8, 128], strides = [1, 1]} : vector<8x512xf32> to vector<8x128xf32>
      %18 = arith.negf %17 : vector<8x128xf32>
      %19 = math.exp %18 : vector<8x128xf32>
      %cst_19 = arith.constant 1.000000e+00 : f32
      %20 = vector.broadcast %cst_19 : f32 to vector<8x128xf32>
      %21 = arith.addf %20, %19 : vector<8x128xf32>
      %22 = arith.divf %20, %21 : vector<8x128xf32>
      %23 = vector.extract_strided_slice %16 {offsets = [0, 128], sizes = [8, 128], strides = [1, 1]} : vector<8x512xf32> to vector<8x128xf32>
      %24 = arith.negf %23 : vector<8x128xf32>
      %25 = math.exp %24 : vector<8x128xf32>
      %cst_20 = arith.constant 1.000000e+00 : f32
      %26 = vector.broadcast %cst_20 : f32 to vector<8x128xf32>
      %27 = arith.addf %26, %25 : vector<8x128xf32>
      %28 = arith.divf %26, %27 : vector<8x128xf32>
      %29 = vector.extract_strided_slice %16 {offsets = [0, 256], sizes = [8, 128], strides = [1, 1]} : vector<8x512xf32> to vector<8x128xf32>
      %30 = math.tanh %29 : vector<8x128xf32>
      %31 = vector.extract_strided_slice %16 {offsets = [0, 384], sizes = [8, 128], strides = [1, 1]} : vector<8x512xf32> to vector<8x128xf32>
      %32 = arith.negf %31 : vector<8x128xf32>
      %33 = math.exp %32 : vector<8x128xf32>
      %cst_21 = arith.constant 1.000000e+00 : f32
      %34 = vector.broadcast %cst_21 : f32 to vector<8x128xf32>
      %35 = arith.addf %34, %33 : vector<8x128xf32>
      %36 = arith.divf %34, %35 : vector<8x128xf32>
      %37 = arith.mulf %28, %arg12 : vector<8x128xf32>
      %38 = arith.mulf %22, %30 : vector<8x128xf32>
      %39 = arith.addf %37, %38 : vector<8x128xf32>
      %40 = math.tanh %39 : vector<8x128xf32>
      %41 = arith.mulf %36, %40 : vector<8x128xf32>
      %42 = vector.shape_cast %41 : vector<8x128xf32> to vector<8x1x128xf32>
      "tpu.trace_start"() <{level = 10 : i32, message = "bqh,bsh->bqs"}> : () -> ()
      %cst_22 = arith.constant dense<0.000000e+00> : vector<8x1x8xf32>
      %43 = tpu.matmul %42, %0, %cst_22 {dimension_numbers = #tpu.dot_dimension_numbers<[2], [2], [1], [1], [0, 0, 0, 1, 1, 1], [0], [0]>} : vector<8x1x128xf32>, vector<8x8x128xf32>, vector<8x1x8xf32> -> vector<8x1x8xf32>
      "tpu.trace_stop"() : () -> ()
      %cst_23 = arith.constant dense<0xFF800000> : vector<8x1xf32>
      %44 = vector.multi_reduction <maximumf>, %43, %cst_23 [2] : vector<8x1x8xf32> to vector<8x1xf32>
      %45 = vector.shape_cast %44 : vector<8x1xf32> to vector<8x1x1xf32>
      %46 = vector.broadcast %45 : vector<8x1x1xf32> to vector<8x1x8xf32>
      %47 = arith.subf %43, %46 : vector<8x1x8xf32>
      %48 = math.exp %47 : vector<8x1x8xf32>
      %cst_24 = arith.constant dense<0.000000e+00> : vector<8x1xf32>
      %49 = vector.multi_reduction <add>, %48, %cst_24 [2] : vector<8x1x8xf32> to vector<8x1xf32>
      %50 = vector.shape_cast %49 : vector<8x1xf32> to vector<8x1x1xf32>
      %51 = tpu.reciprocal %50 {approx = true} : vector<8x1x1xf32> -> vector<8x1x1xf32>
      %52 = vector.broadcast %51 : vector<8x1x1xf32> to vector<8x1x8xf32>
      %53 = arith.mulf %48, %52 : vector<8x1x8xf32>
      "tpu.trace_start"() <{level = 10 : i32, message = "bqs,bsk->bqk"}> : () -> ()
      %cst_25 = arith.constant dense<0.000000e+00> : vector<8x1x256xf32>
      %54 = tpu.matmul %53, %1, %cst_25 {dimension_numbers = #tpu.dot_dimension_numbers<[2], [1], [1], [2], [0, 0, 0, 1, 1, 2], [0], [0]>} : vector<8x1x8xf32>, vector<8x8x256xf32>, vector<8x1x256xf32> -> vector<8x1x256xf32>
      "tpu.trace_stop"() : () -> ()
      %55 = vector.shape_cast %54 : vector<8x1x256xf32> to vector<8x256xf32>
      %56 = tpu.concatenate %41, %55 in 1 : vector<8x128xf32>, vector<8x256xf32> -> vector<8x384xf32>
      %cst_26 = arith.constant dense<0.000000e+00> : vector<8x128xf32>
      %57 = tpu.matmul %56, %3, %cst_26 {dimension_numbers = #tpu.dot_dimension_numbers<[1], [0], [0], [1], [0, 0, 1, 1], [], []>} : vector<8x384xf32>, vector<384x128xf32>, vector<8x128xf32> -> vector<8x128xf32>
      %58 = math.tanh %57 : vector<8x128xf32>
      %59 = arith.index_cast %arg10 : i32 to index
      %c0_27 = arith.constant 0 : index
      %c0_28 = arith.constant 0 : index
      %60 = vector.load %arg9[%59, %c0_27, %c0_28] : memref<5x8x128xf32, #tpu.memory_space<vmem>>, vector<1x8x128xf32>
      %61 = vector.shape_cast %60 : vector<1x8x128xf32> to vector<8x128xf32>
      %62 = vector.shape_cast %58 : vector<8x128xf32> to vector<1x8x128xf32>
      tpu.vector_store %arg9[%59, %c0_27, %c0_28], %62 {strides = array<i32>} : memref<5x8x128xf32, #tpu.memory_space<vmem>>, vector<1x8x128xf32>,
      scf.yield %41, %39, %58 : vector<8x128xf32>, vector<8x128xf32>, vector<8x128xf32>
    }
    %c5_i32_15 = arith.constant 5 : i32
    return
  }
  func.func @transform_0(%arg0: i32) -> (i32, i32, i32) {
    %c0_i32 = arith.constant 0 : i32
    %c0_i32_0 = arith.constant 0 : i32
    %c0_i32_1 = arith.constant 0 : i32
    return %c0_i32, %arg0, %c0_i32_0 : i32, i32, i32
  }
  func.func @transform_1(%arg0: i32) -> (i32, i32, i32) {
    %c0_i32 = arith.constant 0 : i32
    %c0_i32_0 = arith.constant 0 : i32
    %c0_i32_1 = arith.constant 0 : i32
    return %arg0, %c0_i32, %c0_i32_0 : i32, i32, i32
  }
  func.func @transform_2(%arg0: i32) -> (i32, i32, i32) {
    %c0_i32 = arith.constant 0 : i32
    %c0_i32_0 = arith.constant 0 : i32
    %c0_i32_1 = arith.constant 0 : i32
    return %arg0, %c0_i32, %c0_i32_0 : i32, i32, i32
  }
  func.func @transform_3(%arg0: i32) -> (i32, i32) {
    %c0_i32 = arith.constant 0 : i32
    %c0_i32_0 = arith.constant 0 : i32
    return %arg0, %c0_i32 : i32, i32
  }
  func.func @transform_4(%arg0: i32) -> (i32, i32) {
    %c0_i32 = arith.constant 0 : i32
    %c0_i32_0 = arith.constant 0 : i32
    return %arg0, %c0_i32 : i32, i32
  }
  func.func @transform_5(%arg0: i32) -> (i32, i32) {
    %c0_i32 = arith.constant 0 : i32
    %c0_i32_0 = arith.constant 0 : i32
    %c0_i32_1 = arith.constant 0 : i32
    return %c0_i32, %c0_i32_0 : i32, i32
  }
  func.func @transform_6(%arg0: i32) -> (i32, i32) {
    %c0_i32 = arith.constant 0 : i32
    %c0_i32_0 = arith.constant 0 : i32
    %c0_i32_1 = arith.constant 0 : i32
    return %c0_i32, %c0_i32_0 : i32, i32
  }
  func.func @transform_7(%arg0: i32) -> (i32, i32) {
    %c0_i32 = arith.constant 0 : i32
    %c0_i32_0 = arith.constant 0 : i32
    %c0_i32_1 = arith.constant 0 : i32
    return %c0_i32, %c0_i32_0 : i32, i32
  }
  func.func @transform_8(%arg0: i32) -> (i32, i32, i32) {
    %c0_i32 = arith.constant 0 : i32
    %c0_i32_0 = arith.constant 0 : i32
    %c0_i32_1 = arith.constant 0 : i32
    return %c0_i32, %arg0, %c0_i32_0 : i32, i32, i32
  }
}

</mosaic_0001>

<bundles_post_ra>
// kernel: tpu_custom_call.1
= control target key start
LH: loop header
LB: loop body
LE: loop exit
PB: predicated region body
PF: predicated region fallthrough
CT: control target
= control target key end

     0   :  { %13 = vsyncpa [#allocation3], 0  ;;  %s4118_s0 = inlined_call_operand.hbm [shape: f32[5,8,128], index: 0, kind: input, shape index: {}]   ;;  %s4119_s1 = inlined_call_operand.hbm [shape: f32[8,8,128], index: 1, kind: input, shape index: {}]   ;;  %s4120_s2 = inlined_call_operand.hbm [shape: f32[8,8,256], index: 2, kind: input, shape index: {}]   ;;  %s4121_s3 = inlined_call_operand.hbm [shape: f32[8,128], index: 3, kind: input, shape index: {}]   ;;  %s4122_s4 = inlined_call_operand.hbm [shape: f32[8,128], index: 4, kind: input, shape index: {}]   ;;  %s4123_s5 = inlined_call_operand.hbm [shape: f32[384,512], index: 5, kind: input, shape index: {}]   ;;  %s4124_s6 = inlined_call_operand.hbm [shape: f32[1,512], index: 6, kind: input, shape index: {}]   ;;  %s4125_s7 = inlined_call_operand.hbm [shape: f32[384,128], index: 7, kind: input, shape index: {}]   ;;  %s4126_s8 = inlined_call_operand.hbm [shape: f32[5,8,128], index: 8, kind: output, shape index: {}]  }
   0x1   :  { %14 = vsyncpa [#allocation6], 0 }
   0x2   :  { %15 = vsyncpa [#allocation9], 0 }
   0x3   :  { %16 = vsyncpa [#allocation12], 0 }
   0x4   :  { %17 = vsyncpa [#allocation15], 0 }
   0x5   :  { %18 = vsyncpa [#allocation4], 0  ;;  %s3030_s27 = smov [#allocation5]   ;;  %s3031_s29 = smov [#allocation8]  }
   0x6   :  { %s36_s28 = sshll.u32 %s3030_s27, 4  ;;  %s61_s30 = sshll.u32 %s3031_s29, 4  ;;  %s37_s28 = int_to_ptr.vmem [resolvable:$true] %s36_s28  ;;  %s62_s30 = int_to_ptr.vmem [resolvable:$true] %s61_s30 }
   0x7   :  { %s2788_s11 = scalar_lea.hbm %s4119_s1, 1024 }
   0x8   :  { %p2789_p0 = scmp.ne.s32.totalorder %s4119_s1, %s2788_s11  ;;  %p2792_p1 = scmp.lt.u32.totalorder %s2788_s11, %s4119_s1 }
   0xa   :  { %p2794_p2 = pnand %p2792_p1, %p2789_p0 }
   0xc   :  { %2797 = shalt.err (!%p2794_p2)
}
   0xd   :  { %s2798_s16 = scalar_lea.vmem %s37_s28, 1024  ;;  %p2803_p4 = scmp.lt.s32.totalorder %s37_s28, %s37_s28 }
   0xe   :  { %p2799_p3 = scmp.ne.s32.totalorder %s37_s28, %s2798_s16  ;;  %p2804_p5 = scmp.lt.s32.totalorder %s2798_s16, %s2798_s16 }
  0x10   :  { %p2805_p6 = por %p2804_p5, %p2803_p4 }
  0x12   :  { %p2806_p7 = pnand %p2805_p6, %p2799_p3 }
  0x14   :  { %2809 = shalt.err (!%p2806_p7)
}
  0x15   :  { %s3032_s17 = smov 128   ;;  %s3033_s18 = smov 8  }
  0x16   :  { %42 = dma.hbm_to_vmem [thread:$0]  %s4119_s1, 1024, %s37_s28, [#allocation6], %s3032_s17, %s3032_s17, %s3033_s18  }
  0x17   :  { %s2810_s23 = scalar_lea.hbm %s4121_s3, 128 }
  0x18   :  { %p2811_p8 = scmp.ne.s32.totalorder %s4121_s3, %s2810_s23  ;;  %p2814_p9 = scmp.lt.u32.totalorder %s2810_s23, %s4121_s3 }
  0x1a   :  { %p2816_p10 = pnand %p2814_p9, %p2811_p8 }
  0x1c   :  { %2819 = shalt.err (!%p2816_p10)
}
  0x1d   :  { %s2820_s29 = scalar_lea.vmem %s62_s30, 128  ;;  %p2825_p12 = scmp.lt.s32.totalorder %s62_s30, %s62_s30 }
  0x1e   :  { %p2821_p11 = scmp.ne.s32.totalorder %s62_s30, %s2820_s29  ;;  %p2826_p13 = scmp.lt.s32.totalorder %s2820_s29, %s2820_s29 }
  0x20   :  { %p2827_p0 = por %p2826_p13, %p2825_p12 }
  0x22   :  { %p2828_p1 = pnand %p2827_p0, %p2821_p11 }
  0x24   :  { %2831 = shalt.err (!%p2828_p1)
}
  0x25   :  { %64 = dma.hbm_to_vmem [thread:$0]  %s4121_s3, 128, %s62_s30, [#allocation9]  }
  0x26   :  { %s3034_s9 = smov [#allocation11]   ;;  %s2832_s13 = scalar_lea.hbm %s4123_s5, 24576 }
  0x27   :  { %s80_s10 = sshll.u32 %s3034_s9, 4  ;;  %p2833_p2 = scmp.ne.s32.totalorder %s4123_s5, %s2832_s13  ;;  %s81_s10 = int_to_ptr.vmem [resolvable:$true] %s80_s10 }
  0x28   :  { %p2836_p3 = scmp.lt.u32.totalorder %s2832_s13, %s4123_s5 }
  0x2a   :  { %p2838_p4 = pnand %p2836_p3, %p2833_p2 }
  0x2c   :  { %2841 = shalt.err (!%p2838_p4)
}
  0x2d   :  { %s2842_s20 = scalar_lea.vmem %s81_s10, 24576  ;;  %p2847_p6 = scmp.lt.s32.totalorder %s81_s10, %s81_s10 }
  0x2e   :  { %p2843_p5 = scmp.ne.s32.totalorder %s81_s10, %s2842_s20  ;;  %p2848_p7 = scmp.lt.s32.totalorder %s2842_s20, %s2842_s20 }
  0x30   :  { %p2849_p8 = por %p2848_p7, %p2847_p6 }
  0x32   :  { %p2850_p9 = pnand %p2849_p8, %p2843_p5 }
  0x34   :  { %2853 = shalt.err (!%p2850_p9)
}
  0x35   :  { %s3035_s3 = smov 512   ;;  %s3036_s30 = smov 32  }
  0x36   :  { %86 = dma.hbm_to_vmem [thread:$0]  %s4123_s5, 24576, %s81_s10, [#allocation12], %s3035_s3, %s3035_s3, %s3036_s30  }
  0x37   :  { %s3037_s23 = smov [#allocation2]   ;;  %s3038_s25 = smov [#allocation7]  }
  0x38   :  { %s24_s24 = sshll.u32 %s3037_s23, 4  ;;  %s48_s26 = sshll.u32 %s3038_s25, 4  ;;  %s25_s24 = int_to_ptr.vmem [resolvable:$true] %s24_s24  ;;  %s49_s26 = int_to_ptr.vmem [resolvable:$true] %s48_s26 }
  0x39   :  { %s2854_s1 = scalar_lea.hbm %s4118_s0, 640 }
  0x3a   :  { %p2855_p10 = scmp.ne.s32.totalorder %s4118_s0, %s2854_s1  ;;  %p2858_p11 = scmp.lt.u32.totalorder %s2854_s1, %s4118_s0 }
  0x3c   :  { %p2860_p12 = pnand %p2858_p11, %p2855_p10 }
  0x3e   :  { %2863 = shalt.err (!%p2860_p12)
}
  0x3f   :  { %s2864_s5 = scalar_lea.vmem %s25_s24, 640  ;;  %p2869_p0 = scmp.lt.s32.totalorder %s25_s24, %s25_s24 }
  0x40   :  { %p2865_p13 = scmp.ne.s32.totalorder %s25_s24, %s2864_s5  ;;  %p2870_p1 = scmp.lt.s32.totalorder %s2864_s5, %s2864_s5 }
  0x42   :  { %p2871_p2 = por %p2870_p1, %p2869_p0 }
  0x44   :  { %p2872_p3 = pnand %p2871_p2, %p2865_p13 }
  0x46   :  { %2875 = shalt.err (!%p2872_p3)
}
  0x47   :  { %30 = dma.hbm_to_vmem [thread:$0]  %s4118_s0, 640, %s25_s24, [#allocation3], %s3032_s17, %s3032_s17, %s3033_s18  }
  0x48   :  { %s2876_s16 = scalar_lea.hbm %s4120_s2, 2048 }
  0x49   :  { %p2877_p4 = scmp.ne.s32.totalorder %s4120_s2, %s2876_s16  ;;  %p2880_p5 = scmp.lt.u32.totalorder %s2876_s16, %s4120_s2 }
  0x4b   :  { %p2882_p6 = pnand %p2880_p5, %p2877_p4 }
  0x4d   :  { %2885 = shalt.err (!%p2882_p6)
}
  0x4e   :  { %s2886_s21 = scalar_lea.vmem %s49_s26, 2048  ;;  %p2891_p8 = scmp.lt.s32.totalorder %s49_s26, %s49_s26 }
  0x4f   :  { %p2887_p7 = scmp.ne.s32.totalorder %s49_s26, %s2886_s21  ;;  %p2892_p9 = scmp.lt.s32.totalorder %s2886_s21, %s2886_s21 }
  0x51   :  { %p2893_p10 = por %p2892_p9, %p2891_p8 }
  0x53   :  { %p2894_p11 = pnand %p2893_p10, %p2887_p7 }
  0x55   :  { %2897 = shalt.err (!%p2894_p11)
}
  0x56   :  { %s3039_s0 = smov 256   ;;  %s3040_s22 = smov 16  }
  0x57   :  { %54 = dma.hbm_to_vmem [thread:$0]  %s4120_s2, 2048, %s49_s26, [#allocation6], %s3039_s0, %s3039_s0, %s3040_s22  }
  0x58   :  { %s3041_s25 = smov [#allocation10]   ;;  %s3042_s29 = smov [#allocation13]  }
  0x59   :  { %s71_s27 = sshll.u32 %s3041_s25, 4  ;;  %s93_s1 = sshll.u32 %s3042_s29, 4  ;;  %s72_s27 = int_to_ptr.vmem [resolvable:$true] %s71_s27  ;;  %s94_s1 = int_to_ptr.vmem [resolvable:$true] %s93_s1 }
  0x5a   :  { %s2898_s11 = scalar_lea.hbm %s4122_s4, 128 }
  0x5b   :  { %p2899_p12 = scmp.ne.s32.totalorder %s4122_s4, %s2898_s11  ;;  %p2902_p13 = scmp.lt.u32.totalorder %s2898_s11, %s4122_s4 }
  0x5d   :  { %p2904_p0 = pnand %p2902_p13, %p2899_p12 }
  0x5f   :  { %2907 = shalt.err (!%p2904_p0)
}
  0x60   :  { %s2908_s2 = scalar_lea.vmem %s72_s27, 128  ;;  %p2913_p2 = scmp.lt.s32.totalorder %s72_s27, %s72_s27 }
  0x61   :  { %p2909_p1 = scmp.ne.s32.totalorder %s72_s27, %s2908_s2  ;;  %p2914_p3 = scmp.lt.s32.totalorder %s2908_s2, %s2908_s2 }
  0x63   :  { %p2915_p4 = por %p2914_p3, %p2913_p2 }
  0x65   :  { %p2916_p5 = pnand %p2915_p4, %p2909_p1 }
  0x67   :  { %2919 = shalt.err (!%p2916_p5)
}
  0x68   :  { %74 = dma.hbm_to_vmem [thread:$0]  %s4122_s4, 128, %s72_s27, [#allocation9]  }
  0x69   :  { %s2920_s19 = scalar_lea.hbm %s4124_s6, 64 }
  0x6a   :  { %p2921_p6 = scmp.ne.s32.totalorder %s4124_s6, %s2920_s19  ;;  %p2924_p7 = scmp.lt.u32.totalorder %s2920_s19, %s4124_s6 }
  0x6c   :  { %p2926_p8 = pnand %p2924_p7, %p2921_p6 }
  0x6e   :  { %2929 = shalt.err (!%p2926_p8)
}
  0x6f   :  { %s2930_s0 = scalar_lea.vmem %s94_s1, 64  ;;  %p2935_p10 = scmp.lt.s32.totalorder %s94_s1, %s94_s1 }
  0x70   :  { %p2931_p9 = scmp.ne.s32.totalorder %s94_s1, %s2930_s0  ;;  %p2936_p11 = scmp.lt.s32.totalorder %s2930_s0, %s2930_s0 }
  0x72   :  { %p2937_p12 = por %p2936_p11, %p2935_p10 }
  0x74   :  { %p2938_p13 = pnand %p2937_p12, %p2931_p9 }
  0x76   :  { %2941 = shalt.err (!%p2938_p13)
}
  0x77   :  { %96 = dma.hbm_to_vmem [thread:$0]  %s4124_s6, 64, %s94_s1, [#allocation12]  }
  0x78   :  { %s3043_s23 = smov [#allocation14]   ;;  %s2942_s29 = scalar_lea.hbm %s4125_s7, 6144 }
  0x79   :  { %s102_s24 = sshll.u32 %s3043_s23, 4  ;;  %p2943_p0 = scmp.ne.s32.totalorder %s4125_s7, %s2942_s29  ;;  %s103_s24 = int_to_ptr.vmem [resolvable:$true] %s102_s24 }
  0x7a   :  { %p2946_p1 = scmp.lt.u32.totalorder %s2942_s29, %s4125_s7 }
  0x7c   :  { %p2948_p2 = pnand %p2946_p1, %p2943_p0 }
  0x7e   :  { %2951 = shalt.err (!%p2948_p2)
}
  0x7f   :  { %s2952_s5 = scalar_lea.vmem %s103_s24, 6144  ;;  %p2957_p4 = scmp.lt.s32.totalorder %s103_s24, %s103_s24 }
  0x80   :  { %p2953_p3 = scmp.ne.s32.totalorder %s103_s24, %s2952_s5  ;;  %p2958_p5 = scmp.lt.s32.totalorder %s2952_s5, %s2952_s5 }
  0x82   :  { %p2959_p6 = por %p2958_p5, %p2957_p4 }
  0x84   :  { %p2960_p7 = pnand %p2959_p6, %p2953_p3 }
  0x86   :  { %2963 = shalt.err (!%p2960_p7)
}
  0x87   :  { %108 = dma.hbm_to_vmem [thread:$0]  %s4125_s7, 6144, %s103_s24, [#allocation15], %s3032_s17, %s3032_s17, %s3033_s18  }
  0x88   :  { %3002 = dma.done.wait [#allocation3], 640  }
  0x89   :  { %3003 = vsyncadd [#allocation3], 4294966656 }
  0x8a   :  { %3004 = dma.done.wait [#allocation6], 3072  }
  0x8b   :  { %3005 = vsyncadd [#allocation6], 4294964224 }
  0x8c   :  { %3006 = dma.done.wait [#allocation9], 256  }
  0x8d   :  { %3007 = vsyncadd [#allocation9], 4294967040 }
  0x8e   :  { %3008 = dma.done.wait [#allocation12], 24640  }
  0x8f   :  { %3009 = vsyncadd [#allocation12], 4294942656 }
  0x90   :  { %3010 = dma.done.wait [#allocation15], 6144  }
  0x91   :  { %3011 = vsyncadd [#allocation15], 4294961152  ;;  %v3199_v0 = vld [vmem:[#allocation5] sm:$0xff]  ;;  %v3201_v1 = vld [vmem:[#allocation5 + $0x8] sm:$0xff]  ;;  %s3735_s7 = smov 0  }
  0x92   :  { %4130 = vst [vmem:[#allocation23_spill] sm:$0xff] %v3199_v0  ;;  %4131 = vst [vmem:[#allocation24_spill] sm:$0xff] %v3201_v1  ;;  %v3203_v2 = vld [vmem:[#allocation5 + $0x10] sm:$0xff]  ;;  %v3205_v3 = vld [vmem:[#allocation5 + $0x18] sm:$0xff] }
  0x93   :  { %4132 = vst [vmem:[#allocation25_spill] sm:$0xff] %v3203_v2  ;;  %4133 = vst [vmem:[#allocation26_spill] sm:$0xff] %v3205_v3  ;;  %v3207_v4 = vld [vmem:[#allocation5 + $0x20] sm:$0xff]  ;;  %v3209_v5 = vld [vmem:[#allocation5 + $0x28] sm:$0xff] }
  0x94   :  { %4134 = vst [vmem:[#allocation27_spill] sm:$0xff] %v3207_v4  ;;  %4135 = vst [vmem:[#allocation28_spill] sm:$0xff] %v3209_v5  ;;  %v3211_v6 = vld [vmem:[#allocation5 + $0x30] sm:$0xff]  ;;  %v3213_v7 = vld [vmem:[#allocation5 + $0x38] sm:$0xff] }
  0x95   :  { %4136 = vst [vmem:[#allocation29_spill] sm:$0xff] %v3211_v6  ;;  %4137 = vst [vmem:[#allocation30_spill] sm:$0xff] %v3213_v7  ;;  %v3215_v8 = vld [vmem:[#allocation7] sm:$0xff]  ;;  %v3217_v9 = vld [vmem:[#allocation7 + $0x8] sm:$0xff] }
  0x96   :  { %4138 = vst [vmem:[#allocation31_spill] sm:$0xff] %v3215_v8  ;;  %4139 = vst [vmem:[#allocation32_spill] sm:$0xff] %v3217_v9  ;;  %v3219_v10 = vld [vmem:[#allocation7 + $0x10] sm:$0xff]  ;;  %v3221_v11 = vld [vmem:[#allocation7 + $0x18] sm:$0xff] }
  0x97   :  { %4140 = vst [vmem:[#allocation33_spill] sm:$0xff] %v3219_v10  ;;  %4141 = vst [vmem:[#allocation34_spill] sm:$0xff] %v3221_v11  ;;  %v3223_v12 = vld [vmem:[#allocation7 + $0x20] sm:$0xff]  ;;  %v3225_v13 = vld [vmem:[#allocation7 + $0x28] sm:$0xff] }
  0x98   :  { %4142 = vst [vmem:[#allocation35_spill] sm:$0xff] %v3223_v12  ;;  %4143 = vst [vmem:[#allocation36_spill] sm:$0xff] %v3225_v13  ;;  %v3227_v14 = vld [vmem:[#allocation7 + $0x30] sm:$0xff]  ;;  %v3229_v15 = vld [vmem:[#allocation7 + $0x38] sm:$0xff] }
  0x99   :  { %4144 = vst [vmem:[#allocation37_spill] sm:$0xff] %v3227_v14  ;;  %4145 = vst [vmem:[#allocation38_spill] sm:$0xff] %v3229_v15  ;;  %v3231_v16 = vld [vmem:[#allocation7 + $0x40] sm:$0xff]  ;;  %v3233_v17 = vld [vmem:[#allocation7 + $0x48] sm:$0xff] }
  0x9a   :  { %4146 = vst [vmem:[#allocation39_spill] sm:$0xff] %v3231_v16  ;;  %4147 = vst [vmem:[#allocation40_spill] sm:$0xff] %v3233_v17  ;;  %v3235_v18 = vld [vmem:[#allocation7 + $0x50] sm:$0xff]  ;;  %v3237_v19 = vld [vmem:[#allocation7 + $0x58] sm:$0xff] }
  0x9b   :  { %4148 = vst [vmem:[#allocation41_spill] sm:$0xff] %v3235_v18  ;;  %4149 = vst [vmem:[#allocation42_spill] sm:$0xff] %v3237_v19  ;;  %v3239_v20 = vld [vmem:[#allocation7 + $0x60] sm:$0xff]  ;;  %v3241_v21 = vld [vmem:[#allocation7 + $0x68] sm:$0xff] }
  0x9c   :  { %4150 = vst [vmem:[#allocation43_spill] sm:$0xff] %v3239_v20  ;;  %4151 = vst [vmem:[#allocation44_spill] sm:$0xff] %v3241_v21  ;;  %v3243_v22 = vld [vmem:[#allocation7 + $0x70] sm:$0xff]  ;;  %v3245_v23 = vld [vmem:[#allocation7 + $0x78] sm:$0xff] }
  0x9d   :  { %4152 = vst [vmem:[#allocation45_spill] sm:$0xff] %v3243_v22  ;;  %4153 = vst [vmem:[#allocation46_spill] sm:$0xff] %v3245_v23  ;;  %v3247_v24 = vld [vmem:[#allocation11] sm:$0xff]  ;;  %v3249_v25 = vld [vmem:[#allocation11 + $0x8] sm:$0xff] }
  0x9e   :  { %4154 = vst [vmem:[#allocation47_spill] sm:$0xff] %v3247_v24  ;;  %4155 = vst [vmem:[#allocation48_spill] sm:$0xff] %v3249_v25  ;;  %v3251_v26 = vld [vmem:[#allocation11 + $0x10] sm:$0xff]  ;;  %v3253_v27 = vld [vmem:[#allocation11 + $0x18] sm:$0xff] }
  0x9f   :  { %4156 = vst [vmem:[#allocation49_spill] sm:$0xff] %v3251_v26  ;;  %4157 = vst [vmem:[#allocation50_spill] sm:$0xff] %v3253_v27  ;;  %v3255_v28 = vld [vmem:[#allocation11 + $0x20] sm:$0xff]  ;;  %v3257_v29 = vld [vmem:[#allocation11 + $0x28] sm:$0xff] }
  0xa0   :  { %4158 = vst [vmem:[#allocation51_spill] sm:$0xff] %v3255_v28  ;;  %4159 = vst [vmem:[#allocation52_spill] sm:$0xff] %v3257_v29  ;;  %v3259_v30 = vld [vmem:[#allocation11 + $0x30] sm:$0xff]  ;;  %v3261_v31 = vld [vmem:[#allocation11 + $0x38] sm:$0xff] }
  0xa1   :  { %v3263_v32 = vld [vmem:[#allocation11 + $0x40] sm:$0xff]  ;;  %v3265_v33 = vld [vmem:[#allocation11 + $0x48] sm:$0xff]  ;;  %v3267_v34 = vld [vmem:[#allocation11 + $0x50] sm:$0xff] }
  0xa2   :  { %v3269_v35 = vld [vmem:[#allocation11 + $0x58] sm:$0xff]  ;;  %v3271_v36 = vld [vmem:[#allocation11 + $0x60] sm:$0xff]  ;;  %v3273_v37 = vld [vmem:[#allocation11 + $0x68] sm:$0xff] }
  0xa3   :  { %v3275_v38 = vld [vmem:[#allocation11 + $0x70] sm:$0xff]  ;;  %v3277_v39 = vld [vmem:[#allocation11 + $0x78] sm:$0xff]  ;;  %v3279_v40 = vld [vmem:[#allocation11 + $0x80] sm:$0xff] }
  0xa4   :  { %v3281_v41 = vld [vmem:[#allocation11 + $0x88] sm:$0xff]  ;;  %v3283_v42 = vld [vmem:[#allocation11 + $0x90] sm:$0xff]  ;;  %v3285_v43 = vld [vmem:[#allocation11 + $0x98] sm:$0xff] }
  0xa5   :  { %v3287_v44 = vld [vmem:[#allocation11 + $0xa0] sm:$0xff]  ;;  %v3289_v45 = vld [vmem:[#allocation11 + $0xa8] sm:$0xff]  ;;  %v3291_v46 = vld [vmem:[#allocation11 + $0xb0] sm:$0xff] }
  0xa6   :  { %v3293_v47 = vld [vmem:[#allocation11 + $0xb8] sm:$0xff]  ;;  %v3295_v48 = vld [vmem:[#allocation11 + $0xc0] sm:$0xff]  ;;  %v3297_v49 = vld [vmem:[#allocation11 + $0xc8] sm:$0xff] }
  0xa7   :  { %v3299_v50 = vld [vmem:[#allocation11 + $0xd0] sm:$0xff]  ;;  %v3301_v51 = vld [vmem:[#allocation11 + $0xd8] sm:$0xff]  ;;  %v3303_v52 = vld [vmem:[#allocation11 + $0xe0] sm:$0xff] }
  0xa8   :  { %v3305_v53 = vld [vmem:[#allocation11 + $0xe8] sm:$0xff]  ;;  %v3307_v54 = vld [vmem:[#allocation11 + $0xf0] sm:$0xff]  ;;  %v3309_v55 = vld [vmem:[#allocation11 + $0xf8] sm:$0xff] }
  0xa9   :  { %v3311_v56 = vld [vmem:[#allocation11 + $0x100] sm:$0xff]  ;;  %v3313_v57 = vld [vmem:[#allocation11 + $0x108] sm:$0xff]  ;;  %v3315_v58 = vld [vmem:[#allocation11 + $0x110] sm:$0xff] }
  0xaa   :  { %v3317_v59 = vld [vmem:[#allocation11 + $0x118] sm:$0xff]  ;;  %v3319_v60 = vld [vmem:[#allocation11 + $0x120] sm:$0xff]  ;;  %v3321_v61 = vld [vmem:[#allocation11 + $0x128] sm:$0xff] }
  0xab   :  { %v3323_v62 = vld [vmem:[#allocation11 + $0x130] sm:$0xff]  ;;  %v3325_v63 = vld [vmem:[#allocation11 + $0x138] sm:$0xff]  ;;  %v3327_v22 = vld [vmem:[#allocation11 + $0x140] sm:$0xff] }
  0xac   :  { %4160 = vst [vmem:[#allocation53_spill] sm:$0xff] %v3327_v22  ;;  %v3329_v23 = vld [vmem:[#allocation11 + $0x148] sm:$0xff]  ;;  %v3331_v18 = vld [vmem:[#allocation11 + $0x150] sm:$0xff]  ;;  %v3333_v20 = vld [vmem:[#allocation11 + $0x158] sm:$0xff] }
  0xad   :  { %4161 = vst [vmem:[#allocation54_spill] sm:$0xff] %v3329_v23  ;;  %4162 = vst [vmem:[#allocation55_spill] sm:$0xff] %v3331_v18  ;;  %v3335_v21 = vld [vmem:[#allocation11 + $0x160] sm:$0xff]  ;;  %v3337_v19 = vld [vmem:[#allocation11 + $0x168] sm:$0xff] }
  0xae   :  { %4163 = vst [vmem:[#allocation56_spill] sm:$0xff] %v3333_v20  ;;  %4164 = vst [vmem:[#allocation57_spill] sm:$0xff] %v3335_v21  ;;  %v3339_v14 = vld [vmem:[#allocation11 + $0x170] sm:$0xff]  ;;  %v3341_v16 = vld [vmem:[#allocation11 + $0x178] sm:$0xff] }
  0xaf   :  { %4165 = vst [vmem:[#allocation58_spill] sm:$0xff] %v3337_v19  ;;  %4166 = vst [vmem:[#allocation59_spill] sm:$0xff] %v3339_v14  ;;  %v3343_v17 = vld [vmem:[#allocation11 + $0x180] sm:$0xff]  ;;  %v3345_v12 = vld [vmem:[#allocation11 + $0x188] sm:$0xff] }
  0xb0   :  { %4167 = vst [vmem:[#allocation60_spill] sm:$0xff] %v3341_v16  ;;  %4168 = vst [vmem:[#allocation61_spill] sm:$0xff] %v3343_v17  ;;  %v3347_v15 = vld [vmem:[#allocation11 + $0x190] sm:$0xff]  ;;  %v3349_v10 = vld [vmem:[#allocation11 + $0x198] sm:$0xff]  ;;  %v3729_v17 = vmov 0.0  }
  0xb1   :  { %4169 = vst [vmem:[#allocation62_spill] sm:$0xff] %v3345_v12  ;;  %4170 = vst [vmem:[#allocation63_spill] sm:$0xff] %v3347_v15  ;;  %v3351_v13 = vld [vmem:[#allocation11 + $0x1a0] sm:$0xff]  ;;  %v3353_v8 = vld [vmem:[#allocation11 + $0x1a8] sm:$0xff] }
  0xb2   :  { %4171 = vst [vmem:[#allocation64_spill] sm:$0xff] %v3349_v10  ;;  %4172 = vst [vmem:[#allocation65_spill] sm:$0xff] %v3351_v13  ;;  %v3355_v11 = vld [vmem:[#allocation11 + $0x1b0] sm:$0xff]  ;;  %v3357_v7 = vld [vmem:[#allocation11 + $0x1b8] sm:$0xff] }
  0xb3   :  { %4173 = vst [vmem:[#allocation66_spill] sm:$0xff] %v3353_v8  ;;  %4174 = vst [vmem:[#allocation67_spill] sm:$0xff] %v3355_v11  ;;  %v3359_v9 = vld [vmem:[#allocation11 + $0x1c0] sm:$0xff]  ;;  %v3361_v6 = vld [vmem:[#allocation11 + $0x1c8] sm:$0xff] }
  0xb4   :  { %4175 = vst [vmem:[#allocation68_spill] sm:$0xff] %v3357_v7  ;;  %4176 = vst [vmem:[#allocation69_spill] sm:$0xff] %v3359_v9  ;;  %v3363_v5 = vld [vmem:[#allocation11 + $0x1d0] sm:$0xff]  ;;  %v3365_v4 = vld [vmem:[#allocation11 + $0x1d8] sm:$0xff] }
  0xb5   :  { %4177 = vst [vmem:[#allocation70_spill] sm:$0xff] %v3361_v6  ;;  %4178 = vst [vmem:[#allocation71_spill] sm:$0xff] %v3363_v5  ;;  %v3367_v3 = vld [vmem:[#allocation11 + $0x1e0] sm:$0xff]  ;;  %v3369_v2 = vld [vmem:[#allocation11 + $0x1e8] sm:$0xff] }
  0xb6   :  { %4179 = vst [vmem:[#allocation72_spill] sm:$0xff] %v3365_v4  ;;  %4180 = vst [vmem:[#allocation73_spill] sm:$0xff] %v3367_v3  ;;  %v3371_v1 = vld [vmem:[#allocation11 + $0x1f0] sm:$0xff]  ;;  %v3373_v0 = vld [vmem:[#allocation11 + $0x1f8] sm:$0xff] }
  0xb7   :  { %4181 = vst [vmem:[#allocation74_spill] sm:$0xff] %v3369_v2  ;;  %4182 = vst [vmem:[#allocation75_spill] sm:$0xff] %v3371_v1  ;;  %v3375_v15 = vld [vmem:[#allocation11 + $0x200] sm:$0xff]  ;;  %v3377_v11 = vld [vmem:[#allocation11 + $0x208] sm:$0xff] }
  0xb8   :  { %4183 = vst [vmem:[#allocation76_spill] sm:$0xff] %v3373_v0  ;;  %4184 = vst [vmem:[#allocation77_spill] sm:$0xff] %v3375_v15  ;;  %v3379_v13 = vld [vmem:[#allocation11 + $0x210] sm:$0xff]  ;;  %v3381_v9 = vld [vmem:[#allocation11 + $0x218] sm:$0xff] }
  0xb9   :  { %4185 = vst [vmem:[#allocation78_spill] sm:$0xff] %v3377_v11  ;;  %4186 = vst [vmem:[#allocation79_spill] sm:$0xff] %v3379_v13  ;;  %v3383_v6 = vld [vmem:[#allocation11 + $0x220] sm:$0xff]  ;;  %v3385_v5 = vld [vmem:[#allocation11 + $0x228] sm:$0xff] }
  0xba   :  { %4187 = vst [vmem:[#allocation80_spill] sm:$0xff] %v3381_v9  ;;  %4188 = vst [vmem:[#allocation81_spill] sm:$0xff] %v3383_v6  ;;  %v3387_v4 = vld [vmem:[#allocation11 + $0x230] sm:$0xff]  ;;  %v3389_v3 = vld [vmem:[#allocation11 + $0x238] sm:$0xff] }
  0xbb   :  { %4189 = vst [vmem:[#allocation82_spill] sm:$0xff] %v3385_v5  ;;  %4190 = vst [vmem:[#allocation83_spill] sm:$0xff] %v3387_v4  ;;  %v3391_v2 = vld [vmem:[#allocation11 + $0x240] sm:$0xff]  ;;  %v3393_v1 = vld [vmem:[#allocation11 + $0x248] sm:$0xff] }
  0xbc   :  { %4191 = vst [vmem:[#allocation84_spill] sm:$0xff] %v3389_v3  ;;  %4192 = vst [vmem:[#allocation85_spill] sm:$0xff] %v3391_v2  ;;  %v3395_v0 = vld [vmem:[#allocation11 + $0x250] sm:$0xff]  ;;  %v3397_v15 = vld [vmem:[#allocation11 + $0x258] sm:$0xff] }
  0xbd   :  { %4193 = vst [vmem:[#allocation86_spill] sm:$0xff] %v3393_v1  ;;  %4194 = vst [vmem:[#allocation87_spill] sm:$0xff] %v3395_v0  ;;  %v3399_v11 = vld [vmem:[#allocation11 + $0x260] sm:$0xff]  ;;  %v3401_v13 = vld [vmem:[#allocation11 + $0x268] sm:$0xff] }
  0xbe   :  { %4195 = vst [vmem:[#allocation88_spill] sm:$0xff] %v3397_v15  ;;  %4196 = vst [vmem:[#allocation89_spill] sm:$0xff] %v3399_v11  ;;  %v3403_v9 = vld [vmem:[#allocation11 + $0x270] sm:$0xff]  ;;  %v3405_v6 = vld [vmem:[#allocation11 + $0x278] sm:$0xff] }
  0xbf   :  { %4197 = vst [vmem:[#allocation90_spill] sm:$0xff] %v3401_v13  ;;  %4198 = vst [vmem:[#allocation91_spill] sm:$0xff] %v3403_v9  ;;  %v3407_v5 = vld [vmem:[#allocation11 + $0x280] sm:$0xff]  ;;  %v3409_v4 = vld [vmem:[#allocation11 + $0x288] sm:$0xff] }
  0xc0   :  { %4199 = vst [vmem:[#allocation92_spill] sm:$0xff] %v3405_v6  ;;  %4200 = vst [vmem:[#allocation93_spill] sm:$0xff] %v3407_v5  ;;  %v3411_v3 = vld [vmem:[#allocation11 + $0x290] sm:$0xff]  ;;  %v3413_v2 = vld [vmem:[#allocation11 + $0x298] sm:$0xff] }
  0xc1   :  { %4201 = vst [vmem:[#allocation94_spill] sm:$0xff] %v3409_v4  ;;  %4202 = vst [vmem:[#allocation95_spill] sm:$0xff] %v3411_v3  ;;  %v3415_v1 = vld [vmem:[#allocation11 + $0x2a0] sm:$0xff]  ;;  %v3417_v0 = vld [vmem:[#allocation11 + $0x2a8] sm:$0xff] }
  0xc2   :  { %4203 = vst [vmem:[#allocation96_spill] sm:$0xff] %v3413_v2  ;;  %4204 = vst [vmem:[#allocation97_spill] sm:$0xff] %v3415_v1  ;;  %v3419_v15 = vld [vmem:[#allocation11 + $0x2b0] sm:$0xff]  ;;  %v3421_v11 = vld [vmem:[#allocation11 + $0x2b8] sm:$0xff] }
  0xc3   :  { %4205 = vst [vmem:[#allocation98_spill] sm:$0xff] %v3417_v0  ;;  %4206 = vst [vmem:[#allocation99_spill] sm:$0xff] %v3419_v15  ;;  %v3423_v13 = vld [vmem:[#allocation11 + $0x2c0] sm:$0xff]  ;;  %v3425_v9 = vld [vmem:[#allocation11 + $0x2c8] sm:$0xff] }
  0xc4   :  { %4207 = vst [vmem:[#allocation100_spill] sm:$0xff] %v3421_v11  ;;  %4208 = vst [vmem:[#allocation101_spill] sm:$0xff] %v3423_v13  ;;  %v3427_v6 = vld [vmem:[#allocation11 + $0x2d0] sm:$0xff]  ;;  %v3429_v5 = vld [vmem:[#allocation11 + $0x2d8] sm:$0xff] }
  0xc5   :  { %4209 = vst [vmem:[#allocation102_spill] sm:$0xff] %v3425_v9  ;;  %4210 = vst [vmem:[#allocation103_spill] sm:$0xff] %v3427_v6  ;;  %v3431_v4 = vld [vmem:[#allocation11 + $0x2e0] sm:$0xff]  ;;  %v3433_v3 = vld [vmem:[#allocation11 + $0x2e8] sm:$0xff] }
  0xc6   :  { %4211 = vst [vmem:[#allocation104_spill] sm:$0xff] %v3429_v5  ;;  %4212 = vst [vmem:[#allocation105_spill] sm:$0xff] %v3431_v4  ;;  %v3435_v2 = vld [vmem:[#allocation11 + $0x2f0] sm:$0xff]  ;;  %v3437_v1 = vld [vmem:[#allocation11 + $0x2f8] sm:$0xff] }
  0xc7   :  { %4213 = vst [vmem:[#allocation106_spill] sm:$0xff] %v3433_v3  ;;  %4214 = vst [vmem:[#allocation107_spill] sm:$0xff] %v3435_v2  ;;  %v3439_v0 = vld [vmem:[#allocation11 + $0x300] sm:$0xff]  ;;  %v3441_v15 = vld [vmem:[#allocation11 + $0x308] sm:$0xff] }
  0xc8   :  { %4215 = vst [vmem:[#allocation108_spill] sm:$0xff] %v3437_v1  ;;  %4216 = vst [vmem:[#allocation109_spill] sm:$0xff] %v3439_v0  ;;  %v3443_v11 = vld [vmem:[#allocation11 + $0x310] sm:$0xff]  ;;  %v3445_v13 = vld [vmem:[#allocation11 + $0x318] sm:$0xff] }
  0xc9   :  { %4217 = vst [vmem:[#allocation110_spill] sm:$0xff] %v3441_v15  ;;  %4218 = vst [vmem:[#allocation111_spill] sm:$0xff] %v3443_v11  ;;  %v3447_v9 = vld [vmem:[#allocation11 + $0x320] sm:$0xff]  ;;  %v3449_v6 = vld [vmem:[#allocation11 + $0x328] sm:$0xff] }
  0xca   :  { %4219 = vst [vmem:[#allocation112_spill] sm:$0xff] %v3445_v13  ;;  %4220 = vst [vmem:[#allocation113_spill] sm:$0xff] %v3447_v9  ;;  %v3451_v5 = vld [vmem:[#allocation11 + $0x330] sm:$0xff]  ;;  %v3453_v4 = vld [vmem:[#allocation11 + $0x338] sm:$0xff] }
  0xcb   :  { %4221 = vst [vmem:[#allocation114_spill] sm:$0xff] %v3449_v6  ;;  %4222 = vst [vmem:[#allocation115_spill] sm:$0xff] %v3451_v5  ;;  %v3455_v3 = vld [vmem:[#allocation11 + $0x340] sm:$0xff]  ;;  %v3457_v2 = vld [vmem:[#allocation11 + $0x348] sm:$0xff] }
  0xcc   :  { %4223 = vst [vmem:[#allocation116_spill] sm:$0xff] %v3453_v4  ;;  %4224 = vst [vmem:[#allocation117_spill] sm:$0xff] %v3455_v3  ;;  %v3459_v1 = vld [vmem:[#allocation11 + $0x350] sm:$0xff]  ;;  %v3461_v0 = vld [vmem:[#allocation11 + $0x358] sm:$0xff] }
  0xcd   :  { %4225 = vst [vmem:[#allocation118_spill] sm:$0xff] %v3457_v2  ;;  %4226 = vst [vmem:[#allocation119_spill] sm:$0xff] %v3459_v1  ;;  %v3463_v15 = vld [vmem:[#allocation11 + $0x360] sm:$0xff]  ;;  %v3465_v11 = vld [vmem:[#allocation11 + $0x368] sm:$0xff] }
  0xce   :  { %4227 = vst [vmem:[#allocation120_spill] sm:$0xff] %v3461_v0  ;;  %4228 = vst [vmem:[#allocation121_spill] sm:$0xff] %v3463_v15  ;;  %v3467_v13 = vld [vmem:[#allocation11 + $0x370] sm:$0xff]  ;;  %v3469_v9 = vld [vmem:[#allocation11 + $0x378] sm:$0xff] }
  0xcf   :  { %4229 = vst [vmem:[#allocation122_spill] sm:$0xff] %v3465_v11  ;;  %4230 = vst [vmem:[#allocation123_spill] sm:$0xff] %v3467_v13  ;;  %v3471_v6 = vld [vmem:[#allocation11 + $0x380] sm:$0xff]  ;;  %v3473_v5 = vld [vmem:[#allocation11 + $0x388] sm:$0xff] }
  0xd0   :  { %4231 = vst [vmem:[#allocation124_spill] sm:$0xff] %v3469_v9  ;;  %4232 = vst [vmem:[#allocation125_spill] sm:$0xff] %v3471_v6  ;;  %v3475_v4 = vld [vmem:[#allocation11 + $0x390] sm:$0xff]  ;;  %v3477_v3 = vld [vmem:[#allocation11 + $0x398] sm:$0xff] }
  0xd1   :  { %4233 = vst [vmem:[#allocation126_spill] sm:$0xff] %v3473_v5  ;;  %4234 = vst [vmem:[#allocation127_spill] sm:$0xff] %v3475_v4  ;;  %v3479_v2 = vld [vmem:[#allocation11 + $0x3a0] sm:$0xff]  ;;  %v3481_v1 = vld [vmem:[#allocation11 + $0x3a8] sm:$0xff] }
  0xd2   :  { %4235 = vst [vmem:[#allocation128_spill] sm:$0xff] %v3477_v3  ;;  %4236 = vst [vmem:[#allocation129_spill] sm:$0xff] %v3479_v2  ;;  %v3483_v0 = vld [vmem:[#allocation11 + $0x3b0] sm:$0xff]  ;;  %v3485_v15 = vld [vmem:[#allocation11 + $0x3b8] sm:$0xff] }
  0xd3   :  { %4237 = vst [vmem:[#allocation130_spill] sm:$0xff] %v3481_v1  ;;  %4238 = vst [vmem:[#allocation131_spill] sm:$0xff] %v3483_v0  ;;  %v3487_v11 = vld [vmem:[#allocation11 + $0x3c0] sm:$0xff]  ;;  %v3489_v13 = vld [vmem:[#allocation11 + $0x3c8] sm:$0xff] }
  0xd4   :  { %4239 = vst [vmem:[#allocation132_spill] sm:$0xff] %v3485_v15  ;;  %4240 = vst [vmem:[#allocation133_spill] sm:$0xff] %v3487_v11  ;;  %v3491_v9 = vld [vmem:[#allocation11 + $0x3d0] sm:$0xff]  ;;  %v3493_v6 = vld [vmem:[#allocation11 + $0x3d8] sm:$0xff] }
  0xd5   :  { %4241 = vst [vmem:[#allocation134_spill] sm:$0xff] %v3489_v13  ;;  %4242 = vst [vmem:[#allocation135_spill] sm:$0xff] %v3491_v9  ;;  %v3495_v5 = vld [vmem:[#allocation11 + $0x3e0] sm:$0xff]  ;;  %v3497_v4 = vld [vmem:[#allocation11 + $0x3e8] sm:$0xff] }
  0xd6   :  { %4243 = vst [vmem:[#allocation136_spill] sm:$0xff] %v3493_v6  ;;  %4244 = vst [vmem:[#allocation137_spill] sm:$0xff] %v3495_v5  ;;  %v3499_v3 = vld [vmem:[#allocation11 + $0x3f0] sm:$0xff]  ;;  %v3501_v2 = vld [vmem:[#allocation11 + $0x3f8] sm:$0xff] }
  0xd7   :  { %4245 = vst [vmem:[#allocation138_spill] sm:$0xff] %v3497_v4  ;;  %4246 = vst [vmem:[#allocation139_spill] sm:$0xff] %v3499_v3  ;;  %v3503_v1 = vld [vmem:[#allocation11 + $0x400] sm:$0xff]  ;;  %v3505_v0 = vld [vmem:[#allocation11 + $0x408] sm:$0xff] }
  0xd8   :  { %4247 = vst [vmem:[#allocation140_spill] sm:$0xff] %v3501_v2  ;;  %4248 = vst [vmem:[#allocation141_spill] sm:$0xff] %v3503_v1  ;;  %v3507_v15 = vld [vmem:[#allocation11 + $0x410] sm:$0xff]  ;;  %v3509_v11 = vld [vmem:[#allocation11 + $0x418] sm:$0xff] }
  0xd9   :  { %4249 = vst [vmem:[#allocation142_spill] sm:$0xff] %v3505_v0  ;;  %4250 = vst [vmem:[#allocation143_spill] sm:$0xff] %v3507_v15  ;;  %v3511_v13 = vld [vmem:[#allocation11 + $0x420] sm:$0xff]  ;;  %v3513_v9 = vld [vmem:[#allocation11 + $0x428] sm:$0xff] }
  0xda   :  { %4251 = vst [vmem:[#allocation144_spill] sm:$0xff] %v3509_v11  ;;  %4252 = vst [vmem:[#allocation145_spill] sm:$0xff] %v3511_v13  ;;  %v3515_v6 = vld [vmem:[#allocation11 + $0x430] sm:$0xff]  ;;  %v3517_v5 = vld [vmem:[#allocation11 + $0x438] sm:$0xff] }
  0xdb   :  { %4253 = vst [vmem:[#allocation146_spill] sm:$0xff] %v3513_v9  ;;  %4254 = vst [vmem:[#allocation147_spill] sm:$0xff] %v3515_v6  ;;  %v3519_v4 = vld [vmem:[#allocation11 + $0x440] sm:$0xff]  ;;  %v3521_v3 = vld [vmem:[#allocation11 + $0x448] sm:$0xff] }
  0xdc   :  { %4255 = vst [vmem:[#allocation148_spill] sm:$0xff] %v3517_v5  ;;  %4256 = vst [vmem:[#allocation149_spill] sm:$0xff] %v3519_v4  ;;  %v3523_v2 = vld [vmem:[#allocation11 + $0x450] sm:$0xff]  ;;  %v3525_v1 = vld [vmem:[#allocation11 + $0x458] sm:$0xff] }
  0xdd   :  { %4257 = vst [vmem:[#allocation150_spill] sm:$0xff] %v3521_v3  ;;  %4258 = vst [vmem:[#allocation151_spill] sm:$0xff] %v3523_v2  ;;  %v3527_v0 = vld [vmem:[#allocation11 + $0x460] sm:$0xff]  ;;  %v3529_v15 = vld [vmem:[#allocation11 + $0x468] sm:$0xff] }
  0xde   :  { %4259 = vst [vmem:[#allocation152_spill] sm:$0xff] %v3525_v1  ;;  %4260 = vst [vmem:[#allocation153_spill] sm:$0xff] %v3527_v0  ;;  %v3531_v11 = vld [vmem:[#allocation11 + $0x470] sm:$0xff]  ;;  %v3533_v13 = vld [vmem:[#allocation11 + $0x478] sm:$0xff] }
  0xdf   :  { %4261 = vst [vmem:[#allocation154_spill] sm:$0xff] %v3529_v15  ;;  %4262 = vst [vmem:[#allocation155_spill] sm:$0xff] %v3531_v11  ;;  %v3535_v9 = vld [vmem:[#allocation11 + $0x480] sm:$0xff]  ;;  %v3537_v6 = vld [vmem:[#allocation11 + $0x488] sm:$0xff] }
  0xe0   :  { %4263 = vst [vmem:[#allocation156_spill] sm:$0xff] %v3533_v13  ;;  %4264 = vst [vmem:[#allocation157_spill] sm:$0xff] %v3535_v9  ;;  %v3539_v5 = vld [vmem:[#allocation11 + $0x490] sm:$0xff]  ;;  %v3541_v4 = vld [vmem:[#allocation11 + $0x498] sm:$0xff] }
  0xe1   :  { %4265 = vst [vmem:[#allocation158_spill] sm:$0xff] %v3537_v6  ;;  %4266 = vst [vmem:[#allocation159_spill] sm:$0xff] %v3539_v5  ;;  %v3543_v3 = vld [vmem:[#allocation11 + $0x4a0] sm:$0xff]  ;;  %v3545_v2 = vld [vmem:[#allocation11 + $0x4a8] sm:$0xff] }
  0xe2   :  { %4267 = vst [vmem:[#allocation160_spill] sm:$0xff] %v3541_v4  ;;  %4268 = vst [vmem:[#allocation161_spill] sm:$0xff] %v3543_v3  ;;  %v3547_v1 = vld [vmem:[#allocation11 + $0x4b0] sm:$0xff]  ;;  %v3549_v0 = vld [vmem:[#allocation11 + $0x4b8] sm:$0xff] }
  0xe3   :  { %4269 = vst [vmem:[#allocation162_spill] sm:$0xff] %v3545_v2  ;;  %4270 = vst [vmem:[#allocation163_spill] sm:$0xff] %v3547_v1  ;;  %v3551_v15 = vld [vmem:[#allocation11 + $0x4c0] sm:$0xff]  ;;  %v3553_v11 = vld [vmem:[#allocation11 + $0x4c8] sm:$0xff] }
  0xe4   :  { %4271 = vst [vmem:[#allocation164_spill] sm:$0xff] %v3549_v0  ;;  %4272 = vst [vmem:[#allocation165_spill] sm:$0xff] %v3551_v15  ;;  %v3555_v13 = vld [vmem:[#allocation11 + $0x4d0] sm:$0xff]  ;;  %v3557_v9 = vld [vmem:[#allocation11 + $0x4d8] sm:$0xff] }
  0xe5   :  { %4273 = vst [vmem:[#allocation166_spill] sm:$0xff] %v3553_v11  ;;  %4274 = vst [vmem:[#allocation167_spill] sm:$0xff] %v3555_v13  ;;  %v3559_v6 = vld [vmem:[#allocation11 + $0x4e0] sm:$0xff]  ;;  %v3561_v5 = vld [vmem:[#allocation11 + $0x4e8] sm:$0xff] }
  0xe6   :  { %4275 = vst [vmem:[#allocation168_spill] sm:$0xff] %v3557_v9  ;;  %4276 = vst [vmem:[#allocation169_spill] sm:$0xff] %v3559_v6  ;;  %v3563_v4 = vld [vmem:[#allocation11 + $0x4f0] sm:$0xff]  ;;  %v3565_v3 = vld [vmem:[#allocation11 + $0x4f8] sm:$0xff] }
  0xe7   :  { %4277 = vst [vmem:[#allocation170_spill] sm:$0xff] %v3561_v5  ;;  %4278 = vst [vmem:[#allocation171_spill] sm:$0xff] %v3563_v4  ;;  %v3567_v2 = vld [vmem:[#allocation11 + $0x500] sm:$0xff]  ;;  %v3569_v1 = vld [vmem:[#allocation11 + $0x508] sm:$0xff] }
  0xe8   :  { %4279 = vst [vmem:[#allocation172_spill] sm:$0xff] %v3565_v3  ;;  %4280 = vst [vmem:[#allocation173_spill] sm:$0xff] %v3567_v2  ;;  %v3571_v0 = vld [vmem:[#allocation11 + $0x510] sm:$0xff]  ;;  %v3573_v15 = vld [vmem:[#allocation11 + $0x518] sm:$0xff] }
  0xe9   :  { %4281 = vst [vmem:[#allocation174_spill] sm:$0xff] %v3569_v1  ;;  %4282 = vst [vmem:[#allocation175_spill] sm:$0xff] %v3571_v0  ;;  %v3575_v11 = vld [vmem:[#allocation11 + $0x520] sm:$0xff]  ;;  %v3577_v13 = vld [vmem:[#allocation11 + $0x528] sm:$0xff] }
  0xea   :  { %4283 = vst [vmem:[#allocation176_spill] sm:$0xff] %v3573_v15  ;;  %4284 = vst [vmem:[#allocation177_spill] sm:$0xff] %v3575_v11  ;;  %v3579_v9 = vld [vmem:[#allocation11 + $0x530] sm:$0xff]  ;;  %v3581_v6 = vld [vmem:[#allocation11 + $0x538] sm:$0xff] }
  0xeb   :  { %4285 = vst [vmem:[#allocation178_spill] sm:$0xff] %v3577_v13  ;;  %4286 = vst [vmem:[#allocation179_spill] sm:$0xff] %v3579_v9  ;;  %v3583_v5 = vld [vmem:[#allocation11 + $0x540] sm:$0xff]  ;;  %v3585_v4 = vld [vmem:[#allocation11 + $0x548] sm:$0xff] }
  0xec   :  { %4287 = vst [vmem:[#allocation180_spill] sm:$0xff] %v3581_v6  ;;  %4288 = vst [vmem:[#allocation181_spill] sm:$0xff] %v3583_v5  ;;  %v3587_v3 = vld [vmem:[#allocation11 + $0x550] sm:$0xff]  ;;  %v3589_v2 = vld [vmem:[#allocation11 + $0x558] sm:$0xff] }
  0xed   :  { %4289 = vst [vmem:[#allocation182_spill] sm:$0xff] %v3585_v4  ;;  %4290 = vst [vmem:[#allocation183_spill] sm:$0xff] %v3587_v3  ;;  %v3591_v1 = vld [vmem:[#allocation11 + $0x560] sm:$0xff]  ;;  %v3593_v0 = vld [vmem:[#allocation11 + $0x568] sm:$0xff] }
  0xee   :  { %4291 = vst [vmem:[#allocation184_spill] sm:$0xff] %v3589_v2  ;;  %4292 = vst [vmem:[#allocation185_spill] sm:$0xff] %v3591_v1  ;;  %v3595_v15 = vld [vmem:[#allocation11 + $0x570] sm:$0xff]  ;;  %v3597_v11 = vld [vmem:[#allocation11 + $0x578] sm:$0xff] }
  0xef   :  { %4293 = vst [vmem:[#allocation186_spill] sm:$0xff] %v3593_v0  ;;  %4294 = vst [vmem:[#allocation187_spill] sm:$0xff] %v3595_v15  ;;  %v3599_v13 = vld [vmem:[#allocation11 + $0x580] sm:$0xff]  ;;  %v3601_v9 = vld [vmem:[#allocation11 + $0x588] sm:$0xff] }
  0xf0   :  { %4295 = vst [vmem:[#allocation188_spill] sm:$0xff] %v3597_v11  ;;  %4296 = vst [vmem:[#allocation189_spill] sm:$0xff] %v3599_v13  ;;  %v3603_v6 = vld [vmem:[#allocation11 + $0x590] sm:$0xff]  ;;  %v3605_v5 = vld [vmem:[#allocation11 + $0x598] sm:$0xff] }
  0xf1   :  { %4297 = vst [vmem:[#allocation190_spill] sm:$0xff] %v3601_v9  ;;  %4298 = vst [vmem:[#allocation191_spill] sm:$0xff] %v3603_v6  ;;  %v3607_v4 = vld [vmem:[#allocation11 + $0x5a0] sm:$0xff]  ;;  %v3609_v3 = vld [vmem:[#allocation11 + $0x5a8] sm:$0xff] }
  0xf2   :  { %4299 = vst [vmem:[#allocation192_spill] sm:$0xff] %v3605_v5  ;;  %4300 = vst [vmem:[#allocation193_spill] sm:$0xff] %v3607_v4  ;;  %v3611_v2 = vld [vmem:[#allocation11 + $0x5b0] sm:$0xff]  ;;  %v3613_v1 = vld [vmem:[#allocation11 + $0x5b8] sm:$0xff] }
  0xf3   :  { %4301 = vst [vmem:[#allocation194_spill] sm:$0xff] %v3609_v3  ;;  %4302 = vst [vmem:[#allocation195_spill] sm:$0xff] %v3611_v2  ;;  %v3615_v0 = vld [vmem:[#allocation11 + $0x5c0] sm:$0xff]  ;;  %v3617_v15 = vld [vmem:[#allocation11 + $0x5c8] sm:$0xff] }
  0xf4   :  { %4303 = vst [vmem:[#allocation196_spill] sm:$0xff] %v3613_v1  ;;  %4304 = vst [vmem:[#allocation197_spill] sm:$0xff] %v3615_v0  ;;  %v3619_v11 = vld [vmem:[#allocation11 + $0x5d0] sm:$0xff]  ;;  %v3621_v13 = vld [vmem:[#allocation11 + $0x5d8] sm:$0xff] }
  0xf5   :  { %4305 = vst [vmem:[#allocation198_spill] sm:$0xff] %v3617_v15  ;;  %4306 = vst [vmem:[#allocation199_spill] sm:$0xff] %v3619_v11  ;;  %v3623_v9 = vld [vmem:[#allocation11 + $0x5e0] sm:$0xff]  ;;  %v3625_v6 = vld [vmem:[#allocation11 + $0x5e8] sm:$0xff] }
  0xf6   :  { %4307 = vst [vmem:[#allocation200_spill] sm:$0xff] %v3621_v13  ;;  %4308 = vst [vmem:[#allocation201_spill] sm:$0xff] %v3623_v9  ;;  %v3627_v5 = vld [vmem:[#allocation11 + $0x5f0] sm:$0xff]  ;;  %v3629_v4 = vld [vmem:[#allocation11 + $0x5f8] sm:$0xff] }
  0xf7   :  { %4309 = vst [vmem:[#allocation202_spill] sm:$0xff] %v3625_v6  ;;  %4310 = vst [vmem:[#allocation203_spill] sm:$0xff] %v3627_v5  ;;  %v3631_v3 = vld [vmem:[#allocation14] sm:$0xff]  ;;  %v3633_v2 = vld [vmem:[#allocation14 + $0x8] sm:$0xff] }
  0xf8   :  { %4311 = vst [vmem:[#allocation204_spill] sm:$0xff] %v3629_v4  ;;  %4312 = vst [vmem:[#allocation205_spill] sm:$0xff] %v3631_v3  ;;  %v3635_v1 = vld [vmem:[#allocation14 + $0x10] sm:$0xff]  ;;  %v3637_v0 = vld [vmem:[#allocation14 + $0x18] sm:$0xff] }
  0xf9   :  { %4313 = vst [vmem:[#allocation206_spill] sm:$0xff] %v3633_v2  ;;  %4314 = vst [vmem:[#allocation207_spill] sm:$0xff] %v3635_v1  ;;  %v3639_v15 = vld [vmem:[#allocation14 + $0x20] sm:$0xff]  ;;  %v3641_v11 = vld [vmem:[#allocation14 + $0x28] sm:$0xff] }
  0xfa   :  { %4315 = vst [vmem:[#allocation208_spill] sm:$0xff] %v3637_v0  ;;  %4316 = vst [vmem:[#allocation209_spill] sm:$0xff] %v3639_v15  ;;  %v3643_v13 = vld [vmem:[#allocation14 + $0x30] sm:$0xff]  ;;  %v3645_v9 = vld [vmem:[#allocation14 + $0x38] sm:$0xff] }
  0xfb   :  { %4317 = vst [vmem:[#allocation210_spill] sm:$0xff] %v3641_v11  ;;  %4318 = vst [vmem:[#allocation211_spill] sm:$0xff] %v3643_v13  ;;  %v3647_v6 = vld [vmem:[#allocation14 + $0x40] sm:$0xff]  ;;  %v3649_v5 = vld [vmem:[#allocation14 + $0x48] sm:$0xff] }
  0xfc   :  { %4319 = vst [vmem:[#allocation212_spill] sm:$0xff] %v3645_v9  ;;  %4320 = vst [vmem:[#allocation213_spill] sm:$0xff] %v3647_v6  ;;  %v3651_v4 = vld [vmem:[#allocation14 + $0x50] sm:$0xff]  ;;  %v3653_v3 = vld [vmem:[#allocation14 + $0x58] sm:$0xff] }
  0xfd   :  { %4321 = vst [vmem:[#allocation214_spill] sm:$0xff] %v3649_v5  ;;  %4322 = vst [vmem:[#allocation215_spill] sm:$0xff] %v3651_v4  ;;  %v3655_v2 = vld [vmem:[#allocation14 + $0x60] sm:$0xff]  ;;  %v3657_v1 = vld [vmem:[#allocation14 + $0x68] sm:$0xff] }
  0xfe   :  { %4323 = vst [vmem:[#allocation216_spill] sm:$0xff] %v3653_v3  ;;  %4324 = vst [vmem:[#allocation217_spill] sm:$0xff] %v3655_v2  ;;  %v3659_v0 = vld [vmem:[#allocation14 + $0x70] sm:$0xff]  ;;  %v3661_v15 = vld [vmem:[#allocation14 + $0x78] sm:$0xff] }
  0xff   :  { %4325 = vst [vmem:[#allocation218_spill] sm:$0xff] %v3657_v1  ;;  %4326 = vst [vmem:[#allocation219_spill] sm:$0xff] %v3659_v0  ;;  %v3663_v11 = vld [vmem:[#allocation14 + $0x80] sm:$0xff]  ;;  %v3665_v13 = vld [vmem:[#allocation14 + $0x88] sm:$0xff] }
 0x100   :  { %4327 = vst [vmem:[#allocation220_spill] sm:$0xff] %v3661_v15  ;;  %4328 = vst [vmem:[#allocation221_spill] sm:$0xff] %v3663_v11  ;;  %v3667_v9 = vld [vmem:[#allocation14 + $0x90] sm:$0xff]  ;;  %v3669_v6 = vld [vmem:[#allocation14 + $0x98] sm:$0xff] }
 0x101   :  { %4329 = vst [vmem:[#allocation222_spill] sm:$0xff] %v3665_v13  ;;  %4330 = vst [vmem:[#allocation223_spill] sm:$0xff] %v3667_v9  ;;  %v3671_v5 = vld [vmem:[#allocation14 + $0xa0] sm:$0xff]  ;;  %v3673_v4 = vld [vmem:[#allocation14 + $0xa8] sm:$0xff] }
 0x102   :  { %4331 = vst [vmem:[#allocation224_spill] sm:$0xff] %v3669_v6  ;;  %4332 = vst [vmem:[#allocation225_spill] sm:$0xff] %v3671_v5  ;;  %v3675_v3 = vld [vmem:[#allocation14 + $0xb0] sm:$0xff]  ;;  %v3677_v2 = vld [vmem:[#allocation14 + $0xb8] sm:$0xff] }
 0x103   :  { %4333 = vst [vmem:[#allocation226_spill] sm:$0xff] %v3673_v4  ;;  %4334 = vst [vmem:[#allocation227_spill] sm:$0xff] %v3675_v3  ;;  %v3679_v1 = vld [vmem:[#allocation14 + $0xc0] sm:$0xff]  ;;  %v3681_v0 = vld [vmem:[#allocation14 + $0xc8] sm:$0xff] }
 0x104   :  { %4335 = vst [vmem:[#allocation228_spill] sm:$0xff] %v3677_v2  ;;  %4336 = vst [vmem:[#allocation229_spill] sm:$0xff] %v3679_v1  ;;  %v3683_v15 = vld [vmem:[#allocation14 + $0xd0] sm:$0xff]  ;;  %v3685_v11 = vld [vmem:[#allocation14 + $0xd8] sm:$0xff] }
 0x105   :  { %4337 = vst [vmem:[#allocation230_spill] sm:$0xff] %v3681_v0  ;;  %4338 = vst [vmem:[#allocation231_spill] sm:$0xff] %v3683_v15  ;;  %v3687_v13 = vld [vmem:[#allocation14 + $0xe0] sm:$0xff]  ;;  %v3689_v9 = vld [vmem:[#allocation14 + $0xe8] sm:$0xff] }
 0x106   :  { %4339 = vst [vmem:[#allocation232_spill] sm:$0xff] %v3685_v11  ;;  %4340 = vst [vmem:[#allocation233_spill] sm:$0xff] %v3687_v13  ;;  %v3691_v6 = vld [vmem:[#allocation14 + $0xf0] sm:$0xff]  ;;  %v3693_v5 = vld [vmem:[#allocation14 + $0xf8] sm:$0xff] }
 0x107   :  { %4341 = vst [vmem:[#allocation234_spill] sm:$0xff] %v3689_v9  ;;  %4342 = vst [vmem:[#allocation235_spill] sm:$0xff] %v3691_v6  ;;  %v3695_v4 = vld [vmem:[#allocation14 + $0x100] sm:$0xff]  ;;  %v3697_v3 = vld [vmem:[#allocation14 + $0x108] sm:$0xff] }
 0x108   :  { %4343 = vst [vmem:[#allocation236_spill] sm:$0xff] %v3693_v5  ;;  %4344 = vst [vmem:[#allocation237_spill] sm:$0xff] %v3695_v4  ;;  %v3699_v2 = vld [vmem:[#allocation14 + $0x110] sm:$0xff]  ;;  %v3701_v1 = vld [vmem:[#allocation14 + $0x118] sm:$0xff] }
 0x109   :  { %4345 = vst [vmem:[#allocation238_spill] sm:$0xff] %v3697_v3  ;;  %4346 = vst [vmem:[#allocation239_spill] sm:$0xff] %v3699_v2  ;;  %v3703_v0 = vld [vmem:[#allocation14 + $0x120] sm:$0xff]  ;;  %v3705_v15 = vld [vmem:[#allocation14 + $0x128] sm:$0xff] }
 0x10a   :  { %4347 = vst [vmem:[#allocation240_spill] sm:$0xff] %v3701_v1  ;;  %4348 = vst [vmem:[#allocation241_spill] sm:$0xff] %v3703_v0  ;;  %v3707_v11 = vld [vmem:[#allocation14 + $0x130] sm:$0xff]  ;;  %v3709_v13 = vld [vmem:[#allocation14 + $0x138] sm:$0xff] }
 0x10b   :  { %4349 = vst [vmem:[#allocation242_spill] sm:$0xff] %v3705_v15  ;;  %4350 = vst [vmem:[#allocation243_spill] sm:$0xff] %v3707_v11  ;;  %v3711_v9 = vld [vmem:[#allocation14 + $0x140] sm:$0xff]  ;;  %v3713_v6 = vld [vmem:[#allocation14 + $0x148] sm:$0xff] }
 0x10c   :  { %4351 = vst [vmem:[#allocation244_spill] sm:$0xff] %v3709_v13  ;;  %v3715_v5 = vld [vmem:[#allocation14 + $0x150] sm:$0xff]  ;;  %v3717_v4 = vld [vmem:[#allocation14 + $0x158] sm:$0xff]  ;;  %v3719_v3 = vld [vmem:[#allocation14 + $0x160] sm:$0xff] }
 0x10d   :  { %4352 = vst [vmem:[#allocation245_spill] sm:$0xff] %v3715_v5  ;;  %4353 = vst [vmem:[#allocation246_spill] sm:$0xff] %v3717_v4  ;;  %v3721_v2 = vld [vmem:[#allocation14 + $0x168] sm:$0xff]  ;;  %v3723_v1 = vld [vmem:[#allocation14 + $0x170] sm:$0xff] }
 0x10e   :  { %4354 = vst [vmem:[#allocation247_spill] sm:$0xff] %v3719_v3  ;;  %4355 = vst [vmem:[#allocation248_spill] sm:$0xff] %v3721_v2  ;;  %v3725_v0 = vld [vmem:[#allocation14 + $0x178] sm:$0xff]  ;;  %v398_v11 = vld [vmem:[#allocation8] sm:$0xff]  }
 0x10f   :  { %4356 = vst [vmem:[#allocation249_spill] sm:$0xff] %v3723_v1  ;;  %4357 = vst [vmem:[#allocation250_spill] sm:$0xff] %v3725_v0  ;;  %v3727_v15 = vld [vmem:[#allocation13] sm:$0xf]  ;;  %v399_v13 = vld [vmem:[#allocation10] sm:$0xff]  }
 0x110   :  { %4358 = vst [vmem:[#allocation251_spill] sm:$0xff] %v3727_v15 }
 0x111 LB: > { %v4360_v25 = vld [vmem:[#allocation48_spill] sm:$0xff]  ;;  %v4362_v27 = vld [vmem:[#allocation50_spill] sm:$0xff]  ;;  %v4363_v24 = vld [vmem:[#allocation47_spill] sm:$0xff]  ;;  %v2435_v4 = vpack.c.bf16 %v3273_v37, %v3265_v33  ;;  %v2531_v5 = vpack.c.bf16 %v3277_v39, %v3269_v35  ;;  %497 = vmatprep.mubr.f32.mxu0 %v3016_v17  ;;  %639 = vmatprep.mubr.f32.mxu1 %v3016_v17  ;;  %v2447_v17 = vpack.c.bf16 %v3321_v61, %v3313_v57  ;;  %s2276_s10 = sshll.u32 %s3028_s7, 3  ;;  %vm3045_vm0 = vmmov 0   ;;  %s405_s7 = sadd.s32 1, %s3028_s7   ;;  %v3016_v17 = vphi %v3729_v17, %v2787_v17   ;;  %s3028_s7 = sphi %s3735_s7, %s405_s7   ;;  %v3024_v11 = vphi %v398_v11, %v3964_v11   ;;  %v3020_v13 = vphi %v399_v13, %v3961_v13  }
 0x112   : > { %v4361_v29 = vld [vmem:[#allocation52_spill] sm:$0xff]  ;;  %v2527_v1 = vpack.c.bf16 %v3261_v31, %v4362_v27  ;;  %v4364_v28 = vld [vmem:[#allocation51_spill] sm:$0xff]  ;;  %v4365_v26 = vld [vmem:[#allocation49_spill] sm:$0xff]  ;;  %v2533_v27 = vpack.c.bf16 %v3275_v38, %v3267_v34  ;;  %s410_s13 = scalar_lea.vmem [#allocation2], %s2276_s10  ;;  %vm1359_vm1 = vcmask 57344   ;;  %vm1448_vm2 = vcmask 64512  }
 0x113   : > { %v2431_v0 = vpack.c.bf16 %v4361_v29, %v4360_v25  ;;  %v2433_v2 = vpack.c.bf16 %v4364_v28, %v4363_v24  ;;  %v2529_v3 = vpack.c.bf16 %v3259_v30, %v4365_v26  ;;  %v2437_v25 = vpack.c.bf16 %v3271_v36, %v3263_v32  ;;  %v4366_v23 = vld [vmem:[#allocation54_spill] sm:$0xff]  ;;  %v4368_v20 = vld [vmem:[#allocation56_spill] sm:$0xff]  ;;  %v4370_v22 = vld [vmem:[#allocation53_spill] sm:$0xff]  ;;  %s2235_s2 = scalar_lea.vmem [#allocation16], %s2276_s10  ;;  %p402_p8 = scmp.ge.s32.totalorder %s405_s7, 5  }
 0x114   : > { %2528 = vmatprep.subr.bf16.mxu1 %v2527_v1  ;;  %v2439_v24 = vpack.c.bf16 %v3289_v45, %v3281_v41  ;;  %v2535_v26 = vpack.c.bf16 %v3293_v47, %v3285_v43  ;;  %v2537_v1 = vpack.c.bf16 %v3291_v46, %v3283_v42  ;;  %v4367_v19 = vld [vmem:[#allocation58_spill] sm:$0xff]  ;;  %v4369_v16 = vld [vmem:[#allocation60_spill] sm:$0xff]  ;;  %v4371_v21 = vld [vmem:[#allocation57_spill] sm:$0xff]  ;;  %vm2058_vm3 = vcmask 1041409   ;;  %s3048_s26 = smov (%p402_p8), [#allocation16]  }
 0x115   : > { %2432 = vmatprep.subr.bf16.mxu0 %v2431_v0  ;;  %2530 = vmatpush1.bf16.msra.mxu1 %v2529_v3  ;;  %v2441_v0 = vpack.c.bf16 %v3287_v44, %v3279_v40  ;;  %v2539_v3 = vpack.c.bf16 %v3309_v55, %v3301_v51  ;;  %v4372_v18 = vld [vmem:[#allocation55_spill] sm:$0xff]  ;;  %v4374_v12 = vld [vmem:[#allocation62_spill] sm:$0xff]  ;;  %v4376_v10 = vld [vmem:[#allocation64_spill] sm:$0xff]  ;;  %vm2061_vm4 = vcmask 1042434   ;;  %vm2064_vm5 = vcmask 1043459   ;;  %s2242_s14 = sshll.u32 (%p402_p8), %s3048_s26, 4  ;;  %s2243_s14 = int_to_ptr.vmem [resolvable:$true] %s2242_s14 }
 0x116   : > { %2434 = vmatpush1.bf16.msra.mxu0 %v2433_v2  ;;  %2532 = vmatprep.subr.bf16.mxu1 %v2531_v5  ;;  %v2443_v2 = vpack.c.bf16 %v3305_v53, %v3297_v49  ;;  %v2541_v5 = vpack.c.bf16 %v3307_v54, %v3299_v50  ;;  %v4373_v14 = vld [vmem:[#allocation59_spill] sm:$0xff]  ;;  %v4375_v8 = vld [vmem:[#allocation66_spill] sm:$0xff]  ;;  %v4377_v7 = vld [vmem:[#allocation68_spill] sm:$0xff]  ;;  %vm2067_vm6 = vcmask 1044484   ;;  %vm2070_vm7 = vcmask 1045509   ;;  %s2964_s15 = scalar_lea.vmem (%p402_p8), %s2243_s14, 640  ;;  %p2969_p10 = scmp.lt.s32.totalorder (%p402_p8), %s2243_s14, %s2243_s14 }
 0x117   : > { %v4359_v15 = vld [vmem:[#allocation251_spill] sm:$0xff]  ;;  %2436 = vmatprep.subr.bf16.mxu0 %v2435_v4  ;;  %v2445_v4 = vpack.c.bf16 %v3303_v52, %v3295_v48  ;;  %vm2073_vm8 = vcmask 1046534   ;;  %vm2076_vm9 = vcmask 1047559   ;;  %p2965_p9 = scmp.ne.s32.totalorder (%p402_p8), %s2243_s14, %s2964_s15  ;;  %p2970_p11 = scmp.lt.s32.totalorder (%p402_p8), %s2964_s15, %s2964_s15 }
 0x119   : > { %2534 = vmatpush1.bf16.msra.mxu1 %v2533_v27  ;;  %v2451_v27 = vpack.c.bf16 %v4367_v19, %v4366_v23  ;;  %v4382_v19 = vld [vmem:[#allocation70_spill] sm:$0xff]  ;;  %p2971_p12 = por (%p402_p8), %p2970_p11, %p2969_p10 }
 0x11a   : > { %2438 = vmatpush1.bf16.msra.mxu0 %v2437_v25  ;;  %2536 = vmatprep.subr.bf16.mxu1 %v2535_v26  ;;  %v2449_v25 = vpack.c.bf16 %v3319_v60, %v3311_v56  ;;  %v2545_v26 = vpack.c.bf16 %v3323_v62, %v3315_v58 }
 0x11b   : > { %2440 = vmatprep.subr.bf16.mxu0 %v2439_v24  ;;  %v2543_v24 = vpack.c.bf16 %v3325_v63, %v3317_v59  ;;  %p2972_p13 = pnand (%p402_p8), %p2971_p12, %p2965_p9 }
 0x11d   : > { %2538 = vmatpush1.bf16.msra.mxu1 %v2537_v1  ;;  %v2453_v1 = vpack.c.bf16 %v4371_v21, %v4370_v22 }
 0x11e   : > { %2442 = vmatpush1.bf16.msra.mxu0 %v2441_v0  ;;  %2540 = vmatprep.subr.bf16.mxu1 %v2539_v3  ;;  %v2547_v0 = vpack.c.bf16 %v4369_v16, %v4368_v20  ;;  %v2455_v3 = vpack.c.bf16 %v4375_v8, %v4374_v12  ;;  %v4386_v8 = vld [vmem:[#allocation69_spill] sm:$0xff] }
 0x11f   : > { %2444 = vmatprep.subr.bf16.mxu0 %v2443_v2  ;;  %v2549_v2 = vpack.c.bf16 %v4373_v14, %v4372_v18  ;;  %v4383_v14 = vld [vmem:[#allocation74_spill] sm:$0xff]  ;;  %v4385_v18 = vld [vmem:[#allocation76_spill] sm:$0xff] }
 0x121   : > { %2542 = vmatpush1.bf16.msra.mxu1 %v2541_v5  ;;  %v4378_v5 = vld [vmem:[#allocation61_spill] sm:$0xff] }
 0x122   : > { %2446 = vmatpush1.bf16.msra.mxu0 %v2445_v4  ;;  %2544 = vmatprep.subr.bf16.mxu1 %v2543_v24  ;;  %v2551_v4 = vpack.c.bf16 %v4377_v7, %v4376_v10  ;;  %v4387_v7 = vld [vmem:[#allocation73_spill] sm:$0xff]  ;;  %v4389_v10 = vld [vmem:[#allocation75_spill] sm:$0xff] }
 0x123   : > { %2448 = vmatprep.subr.bf16.mxu0 %v2447_v17  ;;  %v4379_v17 = vld [vmem:[#allocation65_spill] sm:$0xff] }
 0x124   : > { %v2457_v24 = vpack.c.bf16 %v4379_v17, %v4378_v5  ;;  %v4390_v5 = vld [vmem:[#allocation78_spill] sm:$0xff] }
 0x125   : > { %2546 = vmatpush1.bf16.msra.mxu1 %v2545_v26  ;;  %v4381_v26 = vld [vmem:[#allocation67_spill] sm:$0xff]  ;;  %v4391_v17 = vld [vmem:[#allocation82_spill] sm:$0xff] }
 0x126   : > { %2450 = vmatpush1.bf16.msra.mxu0 %v2449_v25  ;;  %2548 = vmatprep.subr.bf16.mxu1 %v2547_v0  ;;  %v4380_v25 = vld [vmem:[#allocation63_spill] sm:$0xff]  ;;  %v4384_v0 = vld [vmem:[#allocation72_spill] sm:$0xff] }
 0x127   : > { %2452 = vmatprep.subr.bf16.mxu0 %v2451_v27  ;;  %v2553_v16 = vpack.c.bf16 %v4381_v26, %v4380_v25  ;;  %v2459_v27 = vpack.c.bf16 %v4383_v14, %v4382_v19  ;;  %v2555_v20 = vpack.c.bf16 %v4385_v18, %v4384_v0  ;;  %v4393_v25 = vld [vmem:[#allocation84_spill] sm:$0xff]  ;;  %v4394_v14 = vld [vmem:[#allocation77_spill] sm:$0xff] }
 0x128   : > { %v4395_v18 = vld [vmem:[#allocation81_spill] sm:$0xff] }
 0x129   : > { %2550 = vmatpush1.bf16.msra.mxu1 %v2549_v2  ;;  %v4388_v2 = vld [vmem:[#allocation71_spill] sm:$0xff]  ;;  %v2465_v19 = vpack.c.bf16 %v4395_v18, %v4394_v14  ;;  %v4406_v14 = vld [vmem:[#allocation94_spill] sm:$0xff] }
 0x12a   : > { %2454 = vmatpush1.bf16.msra.mxu0 %v2453_v1  ;;  %2552 = vmatprep.subr.bf16.mxu1 %v2551_v4  ;;  %v2461_v1 = vpack.c.bf16 %v4387_v7, %v4386_v8  ;;  %v2557_v12 = vpack.c.bf16 %v4389_v10, %v4388_v2  ;;  %v4392_v4 = vld [vmem:[#allocation80_spill] sm:$0xff]  ;;  %v4398_v7 = vld [vmem:[#allocation86_spill] sm:$0xff] }
 0x12b   : > { %2456 = vmatprep.subr.bf16.mxu0 %v2455_v3  ;;  %v2463_v3 = vpack.c.bf16 %v4391_v17, %v4390_v5  ;;  %v2559_v26 = vpack.c.bf16 %v4393_v25, %v4392_v4  ;;  %v4399_v8 = vld [vmem:[#allocation90_spill] sm:$0xff]  ;;  %v4402_v5 = vld [vmem:[#allocation85_spill] sm:$0xff]  ;;  %v4405_v4 = vld [vmem:[#allocation91_spill] sm:$0xff] }
 0x12c   : > { %v2467_v10 = vpack.c.bf16 %v4399_v8, %v4398_v7  ;;  %v4403_v17 = vld [vmem:[#allocation89_spill] sm:$0xff]  ;;  %v4407_v18 = vld [vmem:[#allocation98_spill] sm:$0xff] }
 0x12d   : > { %2554 = vmatpush1.bf16.msra.mxu1 %v2553_v16  ;;  %v4396_v16 = vld [vmem:[#allocation79_spill] sm:$0xff]  ;;  %v4410_v7 = vld [vmem:[#allocation93_spill] sm:$0xff] }
 0x12e   : > { %2458 = vmatpush1.bf16.msra.mxu0 %v2457_v24  ;;  %2556 = vmatprep.subr.bf16.mxu1 %v2555_v20  ;;  %v4397_v24 = vld [vmem:[#allocation83_spill] sm:$0xff]  ;;  %v4400_v20 = vld [vmem:[#allocation88_spill] sm:$0xff]  ;;  %v4411_v8 = vld [vmem:[#allocation97_spill] sm:$0xff] }
 0x12f   : > { %2460 = vmatprep.subr.bf16.mxu0 %v2459_v27  ;;  %v2561_v0 = vpack.c.bf16 %v4397_v24, %v4396_v16  ;;  %v4401_v27 = vld [vmem:[#allocation92_spill] sm:$0xff] }
 0x130   : > { %v2563_v2 = vpack.c.bf16 %v4401_v27, %v4400_v20  ;;  %v4409_v16 = vld [vmem:[#allocation100_spill] sm:$0xff]  ;;  %v4413_v20 = vld [vmem:[#allocation99_spill] sm:$0xff] }
 0x131   : > { %2558 = vmatpush1.bf16.msra.mxu1 %v2557_v12  ;;  %v4404_v12 = vld [vmem:[#allocation87_spill] sm:$0xff] }
 0x132   : > { %2462 = vmatpush1.bf16.msra.mxu0 %v2461_v1  ;;  %2560 = vmatprep.subr.bf16.mxu1 %v2559_v26  ;;  %v2469_v1 = vpack.c.bf16 %v4403_v17, %v4402_v5  ;;  %v2565_v25 = vpack.c.bf16 %v4405_v4, %v4404_v12  ;;  %v4408_v26 = vld [vmem:[#allocation96_spill] sm:$0xff]  ;;  %v4414_v5 = vld [vmem:[#allocation102_spill] sm:$0xff] }
 0x133   : > { %2464 = vmatprep.subr.bf16.mxu0 %v2463_v3  ;;  %v2471_v3 = vpack.c.bf16 %v4407_v18, %v4406_v14  ;;  %v2567_v24 = vpack.c.bf16 %v4409_v16, %v4408_v26  ;;  %v4415_v17 = vld [vmem:[#allocation106_spill] sm:$0xff]  ;;  %v4417_v12 = vld [vmem:[#allocation108_spill] sm:$0xff]  ;;  %v4418_v14 = vld [vmem:[#allocation101_spill] sm:$0xff] }
 0x134   : > { %v4419_v18 = vld [vmem:[#allocation105_spill] sm:$0xff]  ;;  %v4421_v26 = vld [vmem:[#allocation107_spill] sm:$0xff] }
 0x135   : > { %2562 = vmatpush1.bf16.msra.mxu1 %v2561_v0  ;;  %v4412_v0 = vld [vmem:[#allocation95_spill] sm:$0xff] }
 0x136   : > { %2466 = vmatpush1.bf16.msra.mxu0 %v2465_v19  ;;  %2564 = vmatprep.subr.bf16.mxu1 %v2563_v2  ;;  %v2473_v19 = vpack.c.bf16 %v4411_v8, %v4410_v7  ;;  %v2569_v27 = vpack.c.bf16 %v4413_v20, %v4412_v0  ;;  %v4416_v2 = vld [vmem:[#allocation104_spill] sm:$0xff]  ;;  %v4422_v7 = vld [vmem:[#allocation110_spill] sm:$0xff] }
 0x137   : > { %2468 = vmatprep.subr.bf16.mxu0 %v2467_v10  ;;  %v2475_v10 = vpack.c.bf16 %v4415_v17, %v4414_v5  ;;  %v2571_v4 = vpack.c.bf16 %v4417_v12, %v4416_v2  ;;  %v4423_v8 = vld [vmem:[#allocation114_spill] sm:$0xff]  ;;  %v4425_v0 = vld [vmem:[#allocation116_spill] sm:$0xff]  ;;  %v4426_v5 = vld [vmem:[#allocation109_spill] sm:$0xff] }
 0x138   : > { %v4427_v17 = vld [vmem:[#allocation113_spill] sm:$0xff]  ;;  %v4429_v2 = vld [vmem:[#allocation115_spill] sm:$0xff] }
 0x139   : > { %2566 = vmatpush1.bf16.msra.mxu1 %v2565_v25  ;;  %v4420_v25 = vld [vmem:[#allocation103_spill] sm:$0xff] }
 0x13a   : > { %2470 = vmatpush1.bf16.msra.mxu0 %v2469_v1  ;;  %2568 = vmatprep.subr.bf16.mxu1 %v2567_v24  ;;  %v2477_v1 = vpack.c.bf16 %v4419_v18, %v4418_v14  ;;  %v2573_v16 = vpack.c.bf16 %v4421_v26, %v4420_v25  ;;  %v4424_v24 = vld [vmem:[#allocation112_spill] sm:$0xff]  ;;  %v4430_v14 = vld [vmem:[#allocation118_spill] sm:$0xff] }
 0x13b   : > { %2472 = vmatprep.subr.bf16.mxu0 %v2471_v3  ;;  %v2479_v3 = vpack.c.bf16 %v4423_v8, %v4422_v7  ;;  %v2575_v20 = vpack.c.bf16 %v4425_v0, %v4424_v24  ;;  %v4431_v18 = vld [vmem:[#allocation122_spill] sm:$0xff]  ;;  %v4433_v25 = vld [vmem:[#allocation124_spill] sm:$0xff]  ;;  %v4434_v7 = vld [vmem:[#allocation117_spill] sm:$0xff] }
 0x13c   : > { %v4436_v8 = vld [vmem:[#allocation119_spill] sm:$0xff] }
 0x13d   : > { %2570 = vmatpush1.bf16.msra.mxu1 %v2569_v27  ;;  %v4428_v27 = vld [vmem:[#allocation111_spill] sm:$0xff] }
 0x13e   : > { %2474 = vmatpush1.bf16.msra.mxu0 %v2473_v19  ;;  %2572 = vmatprep.subr.bf16.mxu1 %v2571_v4  ;;  %v2481_v19 = vpack.c.bf16 %v4427_v17, %v4426_v5  ;;  %v2577_v12 = vpack.c.bf16 %v4429_v2, %v4428_v27  ;;  %v4432_v4 = vld [vmem:[#allocation120_spill] sm:$0xff]  ;;  %v4437_v24 = vld [vmem:[#allocation123_spill] sm:$0xff]  ;;  %v4438_v5 = vld [vmem:[#allocation126_spill] sm:$0xff] }
 0x13f   : > { %2476 = vmatprep.subr.bf16.mxu0 %v2475_v10  ;;  %v2483_v10 = vpack.c.bf16 %v4431_v18, %v4430_v14  ;;  %v2579_v26 = vpack.c.bf16 %v4433_v25, %v4432_v4  ;;  %v2581_v0 = vpack.c.bf16 %v4437_v24, %v4436_v8  ;;  %v4440_v17 = vld [vmem:[#allocation128_spill] sm:$0xff]  ;;  %v4442_v14 = vld [vmem:[#allocation125_spill] sm:$0xff]  ;;  %v4445_v4 = vld [vmem:[#allocation131_spill] sm:$0xff] }
 0x140   : > { %v4441_v27 = vld [vmem:[#allocation132_spill] sm:$0xff] }
 0x141   : > { %2574 = vmatpush1.bf16.msra.mxu1 %v2573_v16  ;;  %v2583_v2 = vpack.c.bf16 %v4441_v27, %v4440_v17  ;;  %v4449_v8 = vld [vmem:[#allocation140_spill] sm:$0xff]  ;;  %v4453_v17 = vld [vmem:[#allocation139_spill] sm:$0xff] }
 0x142   : > { %2478 = vmatpush1.bf16.msra.mxu0 %v2477_v1  ;;  %2576 = vmatprep.subr.bf16.mxu1 %v2575_v20  ;;  %v4435_v1 = vld [vmem:[#allocation121_spill] sm:$0xff] }
 0x143   : > { %2480 = vmatprep.subr.bf16.mxu0 %v2479_v3  ;;  %v2485_v16 = vpack.c.bf16 %v4435_v1, %v4434_v7  ;;  %v4439_v3 = vld [vmem:[#allocation130_spill] sm:$0xff]  ;;  %v4448_v1 = vld [vmem:[#allocation136_spill] sm:$0xff] }
 0x144   : > { %v2487_v20 = vpack.c.bf16 %v4439_v3, %v4438_v5  ;;  %v4446_v7 = vld [vmem:[#allocation134_spill] sm:$0xff]  ;;  %v2587_v24 = vpack.c.bf16 %v4449_v8, %v4448_v1  ;;  %v4452_v3 = vld [vmem:[#allocation135_spill] sm:$0xff] }
 0x145   : > { %2578 = vmatpush1.bf16.msra.mxu1 %v2577_v12  ;;  %v4444_v12 = vld [vmem:[#allocation127_spill] sm:$0xff]  ;;  %v2589_v27 = vpack.c.bf16 %v4453_v17, %v4452_v3  ;;  %v4464_v3 = vld [vmem:[#allocation152_spill] sm:$0xff] }
 0x146   : > { %2482 = vmatpush1.bf16.msra.mxu0 %v2481_v19  ;;  %2580 = vmatprep.subr.bf16.mxu1 %v2579_v26  ;;  %v4443_v19 = vld [vmem:[#allocation129_spill] sm:$0xff]  ;;  %v2585_v25 = vpack.c.bf16 %v4445_v4, %v4444_v12  ;;  %v4457_v12 = vld [vmem:[#allocation148_spill] sm:$0xff]  ;;  %v4460_v1 = vld [vmem:[#allocation143_spill] sm:$0xff] }
 0x147   : > { %2484 = vmatprep.subr.bf16.mxu0 %v2483_v10  ;;  %v2489_v18 = vpack.c.bf16 %v4443_v19, %v4442_v14  ;;  %v4447_v10 = vld [vmem:[#allocation138_spill] sm:$0xff]  ;;  %v4456_v19 = vld [vmem:[#allocation144_spill] sm:$0xff]  ;;  %v4461_v8 = vld [vmem:[#allocation147_spill] sm:$0xff] }
 0x148   : > { %v2491_v26 = vpack.c.bf16 %v4447_v10, %v4446_v7  ;;  %v4454_v14 = vld [vmem:[#allocation142_spill] sm:$0xff]  ;;  %v2591_v4 = vpack.c.bf16 %v4457_v12, %v4456_v19  ;;  %v4459_v7 = vld [vmem:[#allocation145_spill] sm:$0xff]  ;;  %v4465_v17 = vld [vmem:[#allocation156_spill] sm:$0xff] }
 0x149   : > { %2582 = vmatpush1.bf16.msra.mxu1 %v2581_v0  ;;  %v4451_v0 = vld [vmem:[#allocation137_spill] sm:$0xff]  ;;  %v4468_v19 = vld [vmem:[#allocation151_spill] sm:$0xff] }
 0x14a   : > { %2486 = vmatpush1.bf16.msra.mxu0 %v2485_v16  ;;  %2584 = vmatprep.subr.bf16.mxu1 %v2583_v2  ;;  %v4450_v16 = vld [vmem:[#allocation133_spill] sm:$0xff]  ;;  %v4469_v12 = vld [vmem:[#allocation155_spill] sm:$0xff] }
 0x14b   : > { %2488 = vmatprep.subr.bf16.mxu0 %v2487_v20  ;;  %v2493_v5 = vpack.c.bf16 %v4451_v0, %v4450_v16  ;;  %v4455_v20 = vld [vmem:[#allocation146_spill] sm:$0xff]  ;;  %v2593_v16 = vpack.c.bf16 %v4461_v8, %v4460_v1  ;;  %v4472_v1 = vld [vmem:[#allocation160_spill] sm:$0xff] }
 0x14c   : > { %v2495_v2 = vpack.c.bf16 %v4455_v20, %v4454_v14  ;;  %v2595_v14 = vpack.c.bf16 %v4465_v17, %v4464_v3  ;;  %v4473_v8 = vld [vmem:[#allocation164_spill] sm:$0xff]  ;;  %v4476_v3 = vld [vmem:[#allocation159_spill] sm:$0xff] }
 0x14d   : > { %2586 = vmatpush1.bf16.msra.mxu1 %v2585_v25  ;;  %v4458_v25 = vld [vmem:[#allocation141_spill] sm:$0xff]  ;;  %v4477_v17 = vld [vmem:[#allocation163_spill] sm:$0xff] }
 0x14e   : > { %2490 = vmatpush1.bf16.msra.mxu0 %v2489_v18  ;;  %2588 = vmatprep.subr.bf16.mxu1 %v2587_v24  ;;  %v411_v18 = vld [vmem:[%s410_s13] sm:$0xff]  ;;  %v2497_v10 = vpack.c.bf16 %v4459_v7, %v4458_v25  ;;  %v2597_v25 = vpack.c.bf16 %v4469_v12, %v4468_v19  ;;  %v4480_v19 = vld [vmem:[#allocation168_spill] sm:$0xff] }
 0x14f   : > { %2492 = vmatprep.subr.bf16.mxu0 %v2491_v26  ;;  %v4462_v26 = vld [vmem:[#allocation150_spill] sm:$0xff]  ;;  %v4481_v12 = vld [vmem:[#allocation172_spill] sm:$0xff] }
 0x150   : > { %v4463_v24 = vld [vmem:[#allocation154_spill] sm:$0xff] }
 0x151   : > { %2590 = vmatpush1.bf16.msra.mxu1 %v2589_v27  ;;  %v2499_v0 = vpack.c.bf16 %v4463_v24, %v4462_v26  ;;  %v4467_v27 = vld [vmem:[#allocation153_spill] sm:$0xff]  ;;  %v2599_v26 = vpack.c.bf16 %v4473_v8, %v4472_v1  ;;  %v4127_v24 = vmov 0.0   ;;  %v4485_v8 = vld [vmem:[#allocation171_spill] sm:$0xff] }
 0x152   : > { %2494 = vmatpush1.bf16.msra.mxu0 %v2493_v5  ;;  %2592 = vmatprep.subr.bf16.mxu1 %v2591_v4  ;;  %v4466_v5 = vld [vmem:[#allocation149_spill] sm:$0xff]  ;;  %v4471_v4 = vld [vmem:[#allocation162_spill] sm:$0xff] }
 0x153   : > { %2496 = vmatprep.subr.bf16.mxu0 %v2495_v2  ;;  %v2501_v20 = vpack.c.bf16 %v4467_v27, %v4466_v5  ;;  %v4470_v2 = vld [vmem:[#allocation158_spill] sm:$0xff]  ;;  %v4483_v1 = vld [vmem:[#allocation169_spill] sm:$0xff] }
 0x154   : > { %640 = vmatmul.mubr.f32.vlgmr.msra.gmra.mrb[0].mxu1 %v411_v18  ;;  %v2503_v7 = vpack.c.bf16 %v4471_v4, %v4470_v2  ;;  %v4479_v5 = vld [vmem:[#allocation170_spill] sm:$0xff]  ;;  %v2603_v2 = vpack.c.bf16 %v4481_v12, %v4480_v19  ;;  %v4482_v4 = vld [vmem:[#allocation165_spill] sm:$0xff]  ;;  %v4493_v19 = vld [vmem:[#allocation179_spill] sm:$0xff] }
 0x155   : > { %498 = vmatmul.mubr.f32.vlgmr.msra.gmra.mrb[0].mxu0 %v411_v18  ;;  %2594 = vmatpush1.bf16.msra.mxu1 %v2593_v16  ;;  %v4474_v18 = vld [vmem:[#allocation157_spill] sm:$0xff] }
 0x156   : > { %2498 = vmatpush1.bf16.msra.mxu0 %v2497_v10  ;;  %2596 = vmatprep.subr.bf16.mxu1 %v2595_v14  ;;  %v4475_v10 = vld [vmem:[#allocation161_spill] sm:$0xff]  ;;  %v4478_v14 = vld [vmem:[#allocation166_spill] sm:$0xff] }
 0x157   : > { %2500 = vmatprep.subr.bf16.mxu0 %v2499_v0  ;;  %568 = vmatprep.mubr.f32.mxu0 %v4127_v24  ;;  %v2505_v16 = vpack.c.bf16 %v4475_v10, %v4474_v18  ;;  %v2601_v0 = vpack.c.bf16 %v4477_v17, %v4476_v3  ;;  %v2507_v27 = vpack.c.bf16 %v4479_v5, %v4478_v14  ;;  %v4486_v18 = vld [vmem:[#allocation174_spill] sm:$0xff]  ;;  %v4489_v3 = vld [vmem:[#allocation180_spill] sm:$0xff]  ;;  %v4490_v14 = vld [vmem:[#allocation173_spill] sm:$0xff] }
 0x158   : > { %710 = vmatprep.mubr.f32.mxu1 %v4127_v24  ;;  %v4487_v10 = vld [vmem:[#allocation178_spill] sm:$0xff]  ;;  %v4491_v5 = vld [vmem:[#allocation177_spill] sm:$0xff] }
 0x159   : > { %2598 = vmatpush1.bf16.msra.mxu1 %v2597_v25  ;;  %v4484_v25 = vld [vmem:[#allocation167_spill] sm:$0xff] }
 0x15a   : > { %2502 = vmatpush1.bf16.msra.mxu0 %v2501_v20  ;;  %2600 = vmatprep.subr.bf16.mxu1 %v2599_v26  ;;  %v2509_v20 = vpack.c.bf16 %v4483_v1, %v4482_v4  ;;  %v2605_v24 = vpack.c.bf16 %v4485_v8, %v4484_v25  ;;  %v4488_v26 = vld [vmem:[#allocation176_spill] sm:$0xff]  ;;  %v4494_v4 = vld [vmem:[#allocation182_spill] sm:$0xff] }
 0x15b   : > { %2504 = vmatprep.subr.bf16.mxu0 %v2503_v7  ;;  %v2511_v7 = vpack.c.bf16 %v4487_v10, %v4486_v18  ;;  %v2607_v17 = vpack.c.bf16 %v4489_v3, %v4488_v26  ;;  %v4495_v1 = vld [vmem:[#allocation186_spill] sm:$0xff]  ;;  %v4497_v25 = vld [vmem:[#allocation188_spill] sm:$0xff]  ;;  %v4498_v18 = vld [vmem:[#allocation181_spill] sm:$0xff] }
 0x15c   : > { %v4499_v10 = vld [vmem:[#allocation185_spill] sm:$0xff]  ;;  %v4501_v26 = vld [vmem:[#allocation187_spill] sm:$0xff] }
 0x15d   : > { %2602 = vmatpush1.bf16.msra.mxu1 %v2601_v0  ;;  %v4492_v0 = vld [vmem:[#allocation175_spill] sm:$0xff] }
 0x15e   : > { %2506 = vmatpush1.bf16.msra.mxu0 %v2505_v16  ;;  %2604 = vmatprep.subr.bf16.mxu1 %v2603_v2  ;;  %v2513_v16 = vpack.c.bf16 %v4491_v5, %v4490_v14  ;;  %v2609_v12 = vpack.c.bf16 %v4493_v19, %v4492_v0  ;;  %v4496_v2 = vld [vmem:[#allocation184_spill] sm:$0xff]  ;;  %v4502_v14 = vld [vmem:[#allocation190_spill] sm:$0xff] }
 0x15f   : > { %2508 = vmatprep.subr.bf16.mxu0 %v2507_v27  ;;  %v2515_v27 = vpack.c.bf16 %v4495_v1, %v4494_v4  ;;  %v2611_v8 = vpack.c.bf16 %v4497_v25, %v4496_v2  ;;  %v4503_v5 = vld [vmem:[#allocation194_spill] sm:$0xff]  ;;  %v4505_v0 = vld [vmem:[#allocation196_spill] sm:$0xff]  ;;  %v4506_v4 = vld [vmem:[#allocation189_spill] sm:$0xff] }
 0x160   : > { %v4507_v1 = vld [vmem:[#allocation193_spill] sm:$0xff]  ;;  %v4509_v2 = vld [vmem:[#allocation195_spill] sm:$0xff] }
 0x161   : > { %2606 = vmatpush1.bf16.msra.mxu1 %v2605_v24  ;;  %v4500_v24 = vld [vmem:[#allocation183_spill] sm:$0xff] }
 0x162   : > { %2510 = vmatpush1.bf16.msra.mxu0 %v2509_v20  ;;  %2608 = vmatprep.subr.bf16.mxu1 %v2607_v17  ;;  %v2517_v20 = vpack.c.bf16 %v4499_v10, %v4498_v18  ;;  %v2613_v3 = vpack.c.bf16 %v4501_v26, %v4500_v24  ;;  %v4504_v17 = vld [vmem:[#allocation192_spill] sm:$0xff]  ;;  %v4510_v18 = vld [vmem:[#allocation198_spill] sm:$0xff] }
 0x163   : > { %2512 = vmatprep.subr.bf16.mxu0 %v2511_v7  ;;  %v2519_v7 = vpack.c.bf16 %v4503_v5, %v4502_v14  ;;  %v2615_v19 = vpack.c.bf16 %v4505_v0, %v4504_v17  ;;  %v4511_v10 = vld [vmem:[#allocation202_spill] sm:$0xff]  ;;  %v4513_v24 = vld [vmem:[#allocation204_spill] sm:$0xff]  ;;  %v4514_v14 = vld [vmem:[#allocation197_spill] sm:$0xff] }
 0x164   : > { %v4515_v5 = vld [vmem:[#allocation201_spill] sm:$0xff]  ;;  %v4517_v17 = vld [vmem:[#allocation203_spill] sm:$0xff] }
 0x165   : > { %2610 = vmatpush1.bf16.msra.mxu1 %v2609_v12  ;;  %v4508_v12 = vld [vmem:[#allocation191_spill] sm:$0xff] }
 0x166   : > { %2514 = vmatpush1.bf16.msra.mxu0 %v2513_v16  ;;  %2612 = vmatprep.subr.bf16.mxu1 %v2611_v8  ;;  %v2521_v16 = vpack.c.bf16 %v4507_v1, %v4506_v4  ;;  %v2617_v25 = vpack.c.bf16 %v4509_v2, %v4508_v12  ;;  %v4512_v8 = vld [vmem:[#allocation200_spill] sm:$0xff]  ;;  %v413_v1 = vlaneseq }
 0x167   : > { %2516 = vmatprep.subr.bf16.mxu0 %v2515_v27  ;;  %v2523_v27 = vpack.c.bf16 %v4511_v10, %v4510_v18  ;;  %v2619_v26 = vpack.c.bf16 %v4513_v24, %v4512_v8  ;;  %v4520_v4 = vld [vmem:[#allocation24_spill] sm:$0xff] }
 0x169   : > { %2614 = vmatpush1.bf16.msra.mxu1 %v2613_v3  ;;  %v4516_v3 = vld [vmem:[#allocation199_spill] sm:$0xff] }
 0x16a   : > { %2518 = vmatpush1.bf16.msra.mxu0 %v2517_v20  ;;  %2616 = vmatprep.subr.bf16.mxu1 %v2615_v19  ;;  %v2525_v20 = vpack.c.bf16 %v4515_v5, %v4514_v14  ;;  %v2621_v0 = vpack.c.bf16 %v4517_v17, %v4516_v3  ;;  %v4519_v19 = vld [vmem:[#allocation23_spill] sm:$0xff] }
 0x16b   : > { %2520 = vmatprep.subr.bf16.mxu0 %v2519_v7  ;;  %v4518_v7 = vmov 0.0  }
 0x16d   : > { %2618 = vmatpush1.bf16.msra.mxu1 %v2617_v25 }
 0x16e   : > { %2522 = vmatpush1.bf16.msra.mxu0 %v2521_v16  ;;  %2620 = vmatprep.subr.bf16.mxu1 %v2619_v26  ;;  %v414_v16 = vshrl.u32 %v413_v1, 7 }
 0x16f   : > { %2524 = vmatprep.subr.bf16.mxu0 %v2523_v27 }
 0x170   : > { %v415_v12 = vsub.s32 0, %v414_v16  ;;  %v419_v2 = vsub.s32 1, %v414_v16  ;;  %v427_v27 = vsub.s32 3, %v414_v16  ;;  %v423_v17 = vsub.s32 2, %v414_v16 }
 0x171   : > { %2622 = vmatpush1.bf16.msra.mxu1 %v2621_v0 }
 0x172   : > { %2526 = vmatpush1.bf16.msra.mxu0 %v2525_v20  ;;  %2361 = vmatprep.subr.mxu1 %v4518_v7  ;;  %v420_v25 = vrot.slane %v4359_v15, %v419_v2  ;;  %v428_v3 = vrot.slane %v4359_v15, %v427_v27 }
 0x173   : > { %2356 = vmatprep.subr.mxu0 %v4518_v7 }
 0x174   : > { %711 = vmatmul.mubr.f32.vlgmr.msra.gmra.mrb[0].mxu1 %v3024_v11 }
 0x175   : > { %569 = vmatmul.mubr.f32.vlgmr.msra.gmra.mrb[0].mxu0 %v3024_v11  ;;  %2363 = vmatprep.mubr.msk.f32.mxu1 %vm3045_vm0, %v4518_v7  ;;  %v416_v11 = vrot.slane %v4359_v15, %v415_v12 }
 0x176   : > { %2358 = vmatprep.mubr.msk.f32.mxu0 %vm3045_vm0, %v4518_v7 }
 0x17a   : > { %2362 = vmatpush3.xpose.msra.mxu1 %v4520_v4 }
 0x17b   : > { %2357 = vmatpush3.xpose.msra.mxu0 %v4519_v19  ;;  %2371 = vmatprep.subr.mxu1 %v4518_v7  ;;  %v424_v19 = vrot.slane %v4359_v15, %v423_v17 }
 0x17c   : > { %2366 = vmatprep.subr.mxu0 %v4518_v7 }
 0x247   : > { %v712_v10 = vpop.f32.mrb[0].mxu1 }
 0x248   : > { %v570_v18 = vpop.f32.mrb[0].mxu0  ;;  %v714_v26 = vpop.f32.mrb[1].mxu1  ;;  %v2681_v1 = vadd.f32 %v712_v10, %v424_v19  ;;  %v3046_v10 = vmov 1966171168  }
 0x249   : > { %v2679_v8 = vadd.f32 %v570_v18, %v416_v11  ;;  %v572_v24 = vpop.f32.mrb[1].mxu0  ;;  %v2682_v0 = vadd.f32 %v714_v26, %v428_v3 }
 0x24a   : > { %v2680_v14 = vadd.f32 %v572_v24, %v420_v25 }
 0x24b   : > { %v2277_v5 = vmul.f32 -1.442695, %v2679_v8  ;;  %v2279_v4 = vmul.f32 -1.442695, %v2682_v0 }
 0x24c   : > { %v2278_v20 = vmul.f32 -1.442695, %v2680_v14 }
 0x24d   : > { %2738 = vpow2.f32 %v2277_v5  ;;  %v744_v5 = vunpack.c.l.s4 %v3046_v10 }
 0x24e   : > { %2740 = vpow2.f32 %v2278_v20 }
 0x24f   : > { %2742 = vpow2.f32 %v2279_v4  ;;  %v745_v20 = vunpack.c.0.s8 %v744_v5  ;;  %v4525_v5 = vld [vmem:[#allocation29_spill] sm:$0xff] }
 0x250   : > { %2744 = vtanh.f32 %v2681_v1 }
 0x251   : > { %v748_v17 = vsub.s32 %v745_v20, %v414_v16 }
 0x257   : > { %v2739_v12 = vpop.eup %2738 }
 0x258   : > { %v2741_v2 = vpop.eup %2740  ;;  %v720_v21 = vadd.f32 1.0, %v2739_v12 }
 0x259   : > { %v726_v11 = vadd.f32 1.0, %v2741_v2  ;;  %v2743_v25 = vpop.eup %2742 }
 0x25a   : > { %2746 = vrcp.f32 %v720_v21  ;;  %v2745_v18 = vpop.eup %2744  ;;  %v733_v14 = vadd.f32 1.0, %v2743_v25  ;;  %v4521_v25 = vld [vmem:[#allocation25_spill] sm:$0xff] }
 0x25b   : > { %2748 = vrcp.f32 %v726_v11 }
 0x25c   : > { %2750 = vrcp.f32 %v733_v14 }
 0x264   : > { %v2747_v8 = vpop.eup %2746 }
 0x265   : > { %v2749_v27 = vpop.eup %2748  ;;  %v737_v24 = vmul.f32 %v2747_v8, %v2745_v18  ;;  %v4522_v18 = vld [vmem:[#allocation26_spill] sm:$0xff] }
 0x266   : > { %v736_v26 = vmul.f32 %v3020_v13, %v2749_v27  ;;  %v2751_v3 = vpop.eup %2750 }
 0x268   : > { %v3961_v13 = vadd.f32 %v737_v24, %v736_v26   ;;  %v4523_v24 = vld [vmem:[#allocation27_spill] sm:$0xff]  ;;  %v4524_v26 = vld [vmem:[#allocation28_spill] sm:$0xff] }
 0x26a   : > { %2752 = vtanh.f32 %v3961_v13 }
 0x274   : > { %v2753_v21 = vpop.eup %2752 }
 0x275   : > { %v3964_v11 = vmul.f32 %v2753_v21, %v2751_v3   ;;  %v4526_v3 = vld [vmem:[#allocation32_spill] sm:$0xff]  ;;  %v4527_v21 = vld [vmem:[#allocation30_spill] sm:$0xff] }
 0x277   : > { %v749_v0 = vrot.slane %v3964_v11, %v748_v17  ;;  %v742_v19 = vcombine.high %v3964_v11, %v3964_v11 }
 0x279   : > { %v765_v4 = vrot.slane %v749_v0, %v748_v17  ;;  %v757_v1 = vcombine.high %v749_v0, %v749_v0  ;;  %v756_v2 = vrot.slane %v742_v19, %v748_v17  ;;  %v4528_v19 = vld [vmem:[#allocation34_spill] sm:$0xff] }
 0x27b   : > { %2359 = vmatmul.mubr.f32.vlgmr.msra.gmra.mrb[2].mxu0 %v765_v4  ;;  %v779_v12 = vrot.slane %v757_v1, %v748_v17  ;;  %v787_v16 = vcombine.high %v765_v4, %v765_v4  ;;  %v758_v27 = vcombine.high %v756_v2, %v756_v2  ;;  %v772_v14 = vrot.slane %v756_v2, %v748_v17  ;;  %v4530_v4 = vld [vmem:[#allocation36_spill] sm:$0xff]  ;;  %v4531_v1 = vld [vmem:[#allocation33_spill] sm:$0xff] }
 0x27c   : > { %2367 = vmatpush3.xpose.msra.mxu0 %v4521_v25  ;;  %2368 = vmatprep.mubr.msk.f32.mxu0 %vm3045_vm0, %v4518_v7 }
 0x27d   : > { %2364 = vmatmul.mubr.f32.vlgmr.msra.gmra.mrb[2].mxu1 %v779_v12  ;;  %2376 = vmatprep.subr.mxu0 %v4518_v7  ;;  %v789_v8 = vcombine.high %v779_v12, %v779_v12  ;;  %v786_v10 = vrot.slane %v758_v27, %v748_v17  ;;  %v788_v20 = vcombine.high %v772_v14, %v772_v14  ;;  %v4529_v17 = vld [vmem:[#allocation31_spill] sm:$0xff]  ;;  %v4532_v12 = vld [vmem:[#allocation38_spill] sm:$0xff] }
 0x27e   : > { %2372 = vmatpush3.xpose.msra.mxu1 %v4522_v18  ;;  %2373 = vmatprep.mubr.msk.f32.mxu1 %vm3045_vm0, %v4518_v7 }
 0x27f   : > { %2369 = vmatmul.mubr.f32.vlgmr.msra.gmra.mrb[4].mxu0 %v787_v16  ;;  %2381 = vmatprep.subr.mxu1 %v4518_v7  ;;  %v790_v0 = vcombine.high %v786_v10, %v786_v10 }
 0x280   : > { %2377 = vmatpush3.xpose.msra.mxu0 %v4523_v24  ;;  %2378 = vmatprep.mubr.msk.f32.mxu0 %vm3045_vm0, %v4518_v7 }
 0x281   : > { %2374 = vmatmul.mubr.f32.vlgmr.msra.gmra.mrb[4].mxu1 %v789_v8  ;;  %2386 = vmatprep.subr.mxu0 %v4518_v7 }
 0x282   : > { %2382 = vmatpush3.xpose.msra.mxu1 %v4524_v26  ;;  %2383 = vmatprep.mubr.msk.f32.mxu1 %vm3045_vm0, %v4518_v7 }
 0x283   : > { %2379 = vmatmul.mubr.f32.vlgmr.msra.gmra.mrb[6].mxu0 %v772_v14  ;;  %2391 = vmatprep.subr.mxu1 %v4518_v7 }
 0x284   : > { %2387 = vmatpush3.xpose.msra.mxu0 %v4525_v5  ;;  %2388 = vmatprep.mubr.msk.f32.mxu0 %vm3045_vm0, %v4518_v7 }
 0x285   : > { %2384 = vmatmul.mubr.f32.vlgmr.msra.gmra.mrb[6].mxu1 %v786_v10  ;;  %1452 = vmatprep.subr.mxu0 %v4526_v3 }
 0x286   : > { %2392 = vmatpush3.xpose.msra.mxu1 %v4527_v21  ;;  %2393 = vmatprep.mubr.msk.f32.mxu1 %vm3045_vm0, %v4518_v7 }
 0x287   : > { %2389 = vmatmul.mubr.f32.vlgmr.msra.gmra.mrb[8].mxu0 %v788_v20  ;;  %1526 = vmatprep.subr.mxu1 %v4528_v19 }
 0x288   : > { %1453 = vmatpush1.msra.mxu0 %v4529_v17  ;;  %1516 = vmatprep.mubr.f32.mxu0 %v4518_v7 }
 0x289   : > { %2394 = vmatmul.mubr.f32.vlgmr.msra.gmra.mrb[8].mxu1 %v790_v0  ;;  %1600 = vmatprep.subr.mxu0 %v4530_v4 }
 0x28a   : > { %1527 = vmatpush1.msra.mxu1 %v4531_v1  ;;  %1590 = vmatprep.mubr.f32.mxu1 %v4518_v7 }
 0x28b   : > { %1674 = vmatprep.subr.mxu1 %v4532_v12 }
 0x34e   : > { %v865_v2 = vpop.f32.mrb[2].mxu0 }
 0x34f   : > { %v2360_v25 = vpop.f32.mrb[3].mxu0  ;;  %v1360_v16 = vsel %vm1359_vm1, %v865_v2, -inf }
 0x350   : > { %1361 = vmax.xlane.f32.xlu0 %v1360_v16  ;;  %v935_v18 = vpop.f32.mrb[2].mxu1 }
 0x351   : > { %v2365_v8 = vpop.f32.mrb[3].mxu1  ;;  %v1363_v26 = vsel %vm1359_vm1, %v935_v18, -inf }
 0x352   : > { %v1005_v27 = vpop.f32.mrb[4].mxu0 }
 0x353   : > { %v2370_v24 = vpop.f32.mrb[5].mxu0  ;;  %v1366_v14 = vsel %vm1359_vm1, %v1005_v27, -inf }
 0x354   : > { %1367 = vmax.xlane.f32.xlu1 %v1366_v14  ;;  %1364 = vmax.xlane.f32.xlu0 %v1363_v26  ;;  %v1075_v10 = vpop.f32.mrb[4].mxu1 }
 0x355   : > { %v2375_v5 = vpop.f32.mrb[5].mxu1  ;;  %v1369_v21 = vsel %vm1359_vm1, %v1075_v10, -inf }
 0x356   : > { %v1145_v20 = vpop.f32.mrb[6].mxu0 }
 0x357   : > { %v2380_v3 = vpop.f32.mrb[7].mxu0  ;;  %v1372_v0 = vsel %vm1359_vm1, %v1145_v20, -inf }
 0x358   : > { %1370 = vmax.xlane.f32.xlu1 %v1369_v21  ;;  %1373 = vmax.xlane.f32.xlu0 %v1372_v0  ;;  %v1215_v19 = vpop.f32.mrb[6].mxu1 }
 0x359   : > { %v2385_v17 = vpop.f32.mrb[7].mxu1  ;;  %v1375_v25 = vsel %vm1359_vm1, %v1215_v19, -inf }
 0x35a   : > { %v1285_v4 = vpop.f32.mrb[8].mxu0 }
 0x35b   : > { %v2390_v1 = vpop.f32.mrb[9].mxu0  ;;  %v1378_v12 = vsel %vm1359_vm1, %v1285_v4, -inf }
 0x35c   : > { %1379 = vmax.xlane.f32.xlu0 %v1378_v12  ;;  %1376 = vmax.xlane.f32.xlu1 %v1375_v25  ;;  %v1355_v16 = vpop.f32.mrb[8].mxu1 }
 0x35d   : > { %v2395_v8 = vpop.f32.mrb[9].mxu1  ;;  %v1381_v24 = vsel %vm1359_vm1, %v1355_v16, -inf }
 0x360   : > { %1382 = vmax.xlane.f32.xlu1 %v1381_v24 }
 0x3dd   : > { %v1362_v14 = vpop.xlane.xlu0 %1361 }
 0x3de   : > { %v1384_v26 = vsub.f32 %v865_v2, %v1362_v14 }
 0x3e0   : > { %v1392_v5 = vmul.f32 1.442695, %v1384_v26 }
 0x3e1   : > { %v1368_v3 = vpop.xlane.xlu1 %1367  ;;  %v1365_v21 = vpop.xlane.xlu0 %1364 }
 0x3e2   : > { %2754 = vpow2.f32 %v1392_v5  ;;  %v1386_v0 = vsub.f32 %v1005_v27, %v1368_v3  ;;  %v1385_v17 = vsub.f32 %v935_v18, %v1365_v21 }
 0x3e4   : > { %v1396_v1 = vmul.f32 1.442695, %v1386_v0  ;;  %v1394_v15 = vmul.f32 1.442695, %v1385_v17 }
 0x3e5   : > { %v1371_v22 = vpop.xlane.xlu1 %1370  ;;  %v1374_v23 = vpop.xlane.xlu0 %1373 }
 0x3e6   : > { %2756 = vpow2.f32 %v1396_v1  ;;  %v1387_v12 = vsub.f32 %v1075_v10, %v1371_v22  ;;  %v1388_v25 = vsub.f32 %v1145_v20, %v1374_v23 }
 0x3e7   : > { %2758 = vpow2.f32 %v1394_v15 }
 0x3e8   : > { %v1398_v8 = vmul.f32 1.442695, %v1387_v12  ;;  %v1400_v28 = vmul.f32 1.442695, %v1388_v25 }
 0x3e9   : > { %v1380_v29 = vpop.xlane.xlu0 %1379  ;;  %v1377_v24 = vpop.xlane.xlu1 %1376 }
 0x3ea   : > { %2760 = vpow2.f32 %v1398_v8  ;;  %v1390_v2 = vsub.f32 %v1285_v4, %v1380_v29  ;;  %v1389_v14 = vsub.f32 %v1215_v19, %v1377_v24 }
 0x3eb   : > { %2762 = vpow2.f32 %v1400_v28 }
 0x3ec   : > { %v2755_v26 = vpop.eup %2754  ;;  %v1404_v5 = vmul.f32 1.442695, %v1390_v2  ;;  %v1402_v27 = vmul.f32 1.442695, %v1389_v14 }
 0x3ed   : > { %v1383_v18 = vpop.xlane.xlu1 %1382  ;;  %v1408_v3 = vsel %vm1359_vm1, %v2755_v26, 0.0 }
 0x3ee   : > { %2764 = vpow2.f32 %v1404_v5  ;;  %v1391_v21 = vsub.f32 %v1355_v16, %v1383_v18  ;;  %1409 = vadd.xlane.f32.xlu0 %v1408_v3 }
 0x3ef   : > { %2766 = vpow2.f32 %v1402_v27 }
 0x3f0   : > { %v2757_v22 = vpop.eup %2756  ;;  %v1406_v15 = vmul.f32 1.442695, %v1391_v21 }
 0x3f1   : > { %v2759_v23 = vpop.eup %2758  ;;  %v1414_v10 = vsel %vm1359_vm1, %v2757_v22, 0.0 }
 0x3f2   : > { %2768 = vpow2.f32 %v1406_v15  ;;  %1415 = vadd.xlane.f32.xlu0 %v1414_v10  ;;  %v1411_v29 = vsel %vm1359_vm1, %v2759_v23, 0.0  ;;  %v4533_v10 = vld [vmem:[#allocation35_spill] sm:$0xff] }
 0x3f3   : > { %1412 = vadd.xlane.f32.xlu1 %v1411_v29 }
 0x3f4   : > { %v2761_v28 = vpop.eup %2760 }
 0x3f5   : > { %v2763_v20 = vpop.eup %2762  ;;  %v1417_v19 = vsel %vm1359_vm1, %v2761_v28, 0.0 }
 0x3f6   : > { %v1420_v4 = vsel %vm1359_vm1, %v2763_v20, 0.0 }
 0x3f7   : > { %1421 = vadd.xlane.f32.xlu0 %v1420_v4  ;;  %1418 = vadd.xlane.f32.xlu1 %v1417_v19  ;;  %v4534_v4 = vld [vmem:[#allocation40_spill] sm:$0xff] }
 0x3f8   : > { %v2765_v16 = vpop.eup %2764 }
 0x3f9   : > { %v2767_v0 = vpop.eup %2766  ;;  %v1426_v17 = vsel %vm1359_vm1, %v2765_v16, 0.0 }
 0x3fa   : > { %v1423_v1 = vsel %vm1359_vm1, %v2767_v0, 0.0 }
 0x3fb   : > { %1427 = vadd.xlane.f32.xlu0 %v1426_v17  ;;  %1424 = vadd.xlane.f32.xlu1 %v1423_v1 }
 0x3fc   : > { %v2769_v12 = vpop.eup %2768 }
 0x3fd   : > { %v1429_v25 = vsel %vm1359_vm1, %v2769_v12, 0.0 }
 0x3ff   : > { %1430 = vadd.xlane.f32.xlu1 %v1429_v25 }
 0x47b   : > { %v1410_v8 = vpop.xlane.xlu0 %1409 }
 0x47c   : > { %2770 = vrcp.f32 %v1410_v8  ;;  %v4536_v8 = vld [vmem:[#allocation37_spill] sm:$0xff] }
 0x47f   : > { %v1416_v24 = vpop.xlane.xlu0 %1415 }
 0x480   : > { %2772 = vrcp.f32 %v1416_v24  ;;  %v1413_v2 = vpop.xlane.xlu1 %1412 }
 0x481   : > { %2774 = vrcp.f32 %v1413_v2 }
 0x484   : > { %v1422_v14 = vpop.xlane.xlu0 %1421  ;;  %v1419_v5 = vpop.xlane.xlu1 %1418 }
 0x485   : > { %2776 = vrcp.f32 %v1422_v14  ;;  %v4538_v14 = vld [vmem:[#allocation44_spill] sm:$0xff] }
 0x486   : > { %v2771_v27 = vpop.eup %2770  ;;  %2778 = vrcp.f32 %v1419_v5  ;;  %v4539_v5 = vld [vmem:[#allocation221_spill] sm:$0xff] }
 0x487   : > { %v1440_v18 = vmul.f32 %v2771_v27, %v2755_v26  ;;  %v4535_v26 = vld [vmem:[#allocation39_spill] sm:$0xff]  ;;  %v4540_v27 = vld [vmem:[#allocation222_spill] sm:$0xff] }
 0x488   : > { %v1428_v3 = vpop.xlane.xlu0 %1427  ;;  %v1425_v21 = vpop.xlane.xlu1 %1424 }
 0x489   : > { %2780 = vrcp.f32 %v1428_v3  ;;  %2280 = vmatmul.mubr.msk.f32.vlgmr.msra.gmra.mrb[10].mxu0 %vm1448_vm2, %v1440_v18  ;;  %v2623_v18 = vpack.c.bf16 %v4540_v27, %v4539_v5  ;;  %v4553_v27 = vld [vmem:[#allocation225_spill] sm:$0xff] }
 0x48a   : > { %v2773_v15 = vpop.eup %2772  ;;  %2782 = vrcp.f32 %v1425_v21  ;;  %1601 = vmatpush1.msra.mxu0 %v4533_v10  ;;  %1664 = vmatprep.mubr.f32.mxu0 %v4518_v7  ;;  %v4541_v21 = vld [vmem:[#allocation43_spill] sm:$0xff]  ;;  %v4543_v10 = vld [vmem:[#allocation206_spill] sm:$0xff] }
 0x48b   : > { %v2775_v29 = vpop.eup %2774  ;;  %v1442_v19 = vmul.f32 %v2773_v15, %v2757_v22  ;;  %1748 = vmatprep.subr.mxu0 %v4534_v4  ;;  %v4537_v22 = vld [vmem:[#allocation42_spill] sm:$0xff]  ;;  %v4542_v15 = vld [vmem:[#allocation205_spill] sm:$0xff] }
 0x48c   : > { %v1441_v17 = vmul.f32 %v2775_v29, %v2759_v23  ;;  %v1431_v1 = vpop.xlane.xlu1 %1430  ;;  %v4544_v4 = vld [vmem:[#allocation41_spill] sm:$0xff] }
 0x48d   : > { %2784 = vrcp.f32 %v1431_v1  ;;  %2282 = vmatmul.mubr.msk.f32.vlgmr.msra.gmra.mrb[12].mxu0 %vm1448_vm2, %v1442_v19  ;;  %v4546_v1 = vld [vmem:[#allocation223_spill] sm:$0xff] }
 0x48e   : > { %2281 = vmatmul.mubr.msk.f32.vlgmr.msra.gmra.mrb[10].mxu1 %vm1448_vm2, %v1441_v17  ;;  %1749 = vmatpush1.msra.mxu0 %v4535_v26  ;;  %v4545_v17 = vld [vmem:[#allocation46_spill] sm:$0xff]  ;;  %v4547_v26 = vld [vmem:[#allocation224_spill] sm:$0xff] }
 0x48f   : > { %v2777_v25 = vpop.eup %2776  ;;  %1675 = vmatpush1.msra.mxu1 %v4536_v8  ;;  %1738 = vmatprep.mubr.f32.mxu1 %v4518_v7 }
 0x490   : > { %v2779_v24 = vpop.eup %2778  ;;  %v1444_v2 = vmul.f32 %v2777_v25, %v2763_v20  ;;  %1812 = vmatprep.mubr.f32.mxu0 %v4518_v7  ;;  %1822 = vmatprep.subr.mxu1 %v4537_v22  ;;  %v2625_v20 = vpack.c.bf16 %v4543_v10, %v4542_v15  ;;  %v2627_v25 = vpack.c.bf16 %v4547_v26, %v4546_v1  ;;  %v3047_v15 = vmov 0.0|0.0   ;;  %v4556_v10 = vld [vmem:[#allocation210_spill] sm:$0xff]  ;;  %v4561_v1 = vld [vmem:[#allocation227_spill] sm:$0xff]  ;;  %v4562_v26 = vld [vmem:[#allocation228_spill] sm:$0xff] }
 0x491   : > { %v1443_v23 = vmul.f32 %v2779_v24, %v2761_v28  ;;  %1896 = vmatprep.subr.mxu0 %v4538_v14  ;;  %v4549_v24 = vld [vmem:[#allocation208_spill] sm:$0xff]  ;;  %v4552_v14 = vld [vmem:[#allocation238_spill] sm:$0xff] }
 0x492   : > { %2284 = vmatmul.mubr.msk.f32.vlgmr.msra.gmra.mrb[14].mxu0 %vm1448_vm2, %v1444_v2 }
 0x493   : > { %v2781_v3 = vpop.eup %2780  ;;  %2283 = vmatmul.mubr.msk.f32.vlgmr.msra.gmra.mrb[12].mxu1 %vm1448_vm2, %v1443_v23  ;;  %1897 = vmatpush1.msra.mxu0 %v4541_v21  ;;  %v4550_v23 = vld [vmem:[#allocation45_spill] sm:$0xff] }
 0x494   : > { %v2783_v29 = vpop.eup %2782  ;;  %v1446_v19 = vmul.f32 %v2781_v3, %v2765_v16  ;;  %1823 = vmatpush1.msra.mxu1 %v4544_v4  ;;  %1886 = vmatprep.mubr.f32.mxu1 %v4518_v7  ;;  %v4548_v16 = vld [vmem:[#allocation207_spill] sm:$0xff]  ;;  %v4554_v3 = vld [vmem:[#allocation226_spill] sm:$0xff]  ;;  %v4559_v4 = vld [vmem:[#allocation241_spill] sm:$0xff] }
 0x495   : > { %v1445_v28 = vmul.f32 %v2783_v29, %v2767_v0  ;;  %1960 = vmatprep.mubr.f32.mxu0 %v4518_v7  ;;  %1970 = vmatprep.subr.mxu1 %v4545_v17  ;;  %v2629_v2 = vpack.c.bf16 %v4549_v24, %v4548_v16  ;;  %v4551_v0 = vld [vmem:[#allocation237_spill] sm:$0xff]  ;;  %v2631_v21 = vpack.c.bf16 %v4554_v3, %v4553_v27  ;;  %v4558_v29 = vld [vmem:[#allocation240_spill] sm:$0xff]  ;;  %v4570_v27 = vld [vmem:[#allocation214_spill] sm:$0xff] }
 0x496   : > { %2286 = vmatmul.mubr.msk.f32.vlgmr.msra.gmra.mrb[16].mxu0 %vm1448_vm2, %v1446_v19  ;;  %2624 = vmatprep.subr.bf16.mxu0 %v2623_v18  ;;  %v2656_v5 = vpack.c.bf16 %v4552_v14, %v4551_v0  ;;  %v4555_v18 = vld [vmem:[#allocation209_spill] sm:$0xff]  ;;  %v4564_v16 = vld [vmem:[#allocation212_spill] sm:$0xff]  ;;  %v4568_v0 = vld [vmem:[#allocation230_spill] sm:$0xff] }
 0x497   : > { %v2785_v8 = vpop.eup %2784  ;;  %2285 = vmatmul.mubr.msk.f32.vlgmr.msra.gmra.mrb[14].mxu1 %vm1448_vm2, %v1445_v28  ;;  %2626 = vmatpush3.bf16.msra.mxu0 %v2625_v20  ;;  %v2633_v20 = vpack.c.bf16 %v4556_v10, %v4555_v18  ;;  %v4560_v28 = vld [vmem:[#allocation242_spill] sm:$0xff]  ;;  %v4571_v18 = vld [vmem:[#allocation231_spill] sm:$0xff]  ;;  %v4572_v10 = vld [vmem:[#allocation232_spill] sm:$0xff] }
 0x498   : > { %v1447_v22 = vmul.f32 %v2785_v8, %v2769_v12  ;;  %1971 = vmatpush1.msra.mxu1 %v4550_v23  ;;  %2034 = vmatprep.mubr.f32.mxu1 %v4518_v7  ;;  %v4557_v12 = vld [vmem:[#allocation239_spill] sm:$0xff]  ;;  %v2662_v17 = vpack.c.bf16 %v4560_v28, %v4559_v4  ;;  %v4575_v4 = vld [vmem:[#allocation245_spill] sm:$0xff]  ;;  %v4576_v28 = vld [vmem:[#allocation246_spill] sm:$0xff] }
 0x499   : > { %2655 = vmatprep.subr.bf16.mxu1 %v3047_v15  ;;  %2628 = vmatprep.subr.bf16.mxu0 %v2627_v25  ;;  %v2659_v19 = vpack.c.bf16 %v4558_v29, %v4557_v12  ;;  %v2635_v25 = vpack.c.bf16 %v4562_v26, %v4561_v1  ;;  %v4563_v8 = vld [vmem:[#allocation211_spill] sm:$0xff]  ;;  %v4574_v29 = vld [vmem:[#allocation216_spill] sm:$0xff]  ;;  %v4577_v1 = vld [vmem:[#allocation233_spill] sm:$0xff] }
 0x49a   : > { %v2637_v24 = vpack.c.bf16 %v4564_v16, %v4563_v8  ;;  %v4573_v12 = vld [vmem:[#allocation215_spill] sm:$0xff]  ;;  %v4578_v26 = vld [vmem:[#allocation234_spill] sm:$0xff]  ;;  %v4579_v8 = vld [vmem:[#allocation217_spill] sm:$0xff] }
 0x49b   : > { %2287 = vmatmul.mubr.msk.f32.vlgmr.msra.gmra.mrb[16].mxu1 %vm1448_vm2, %v1447_v22  ;;  %2630 = vmatpush3.bf16.msra.mxu0 %v2629_v2  ;;  %v4565_v2 = vld [vmem:[#allocation243_spill] sm:$0xff]  ;;  %v4566_v22 = vld [vmem:[#allocation244_spill] sm:$0xff]  ;;  %v4580_v16 = vld [vmem:[#allocation218_spill] sm:$0xff] }
 0x49c   : > { %2657 = vmatpush3.bf16.msra.mxu1 %v2656_v5  ;;  %2632 = vmatprep.subr.bf16.mxu0 %v2631_v21  ;;  %v2665_v23 = vpack.c.bf16 %v4566_v22, %v4565_v2  ;;  %v4569_v5 = vld [vmem:[#allocation213_spill] sm:$0xff]  ;;  %v2668_v21 = vpack.c.bf16 %v3713_v6, %v3711_v9  ;;  %v4581_v2 = vld [vmem:[#allocation247_spill] sm:$0xff]  ;;  %v4582_v22 = vld [vmem:[#allocation248_spill] sm:$0xff] }
 0x49d   : > { %2658 = vmatprep.subr.bf16.mxu1 %v3047_v15  ;;  %2428 = vmatprep.mubr.msk.f32.mxu1 %vm3045_vm0, %v4518_v7  ;;  %v4567_v7 = vld [vmem:[#allocation229_spill] sm:$0xff]  ;;  %v2641_v3 = vpack.c.bf16 %v4570_v27, %v4569_v5  ;;  %v4585_v5 = vld [vmem:[#allocation219_spill] sm:$0xff]  ;;  %v4586_v27 = vld [vmem:[#allocation220_spill] sm:$0xff] }
 0x49e   : > { %v2639_v14 = vpack.c.bf16 %v4568_v0, %v4567_v7  ;;  %v4583_v7 = vld [vmem:[#allocation235_spill] sm:$0xff]  ;;  %v4584_v0 = vld [vmem:[#allocation236_spill] sm:$0xff] }
 0x49f   : > { %2634 = vmatpush3.bf16.msra.mxu0 %v2633_v20  ;;  %v2643_v20 = vpack.c.bf16 %v4572_v10, %v4571_v18  ;;  %v4588_v18 = vld [vmem:[#allocation250_spill] sm:$0xff] }
 0x4a0   : > { %2660 = vmatpush3.bf16.msra.mxu1 %v2659_v19  ;;  %2636 = vmatprep.subr.bf16.mxu0 %v2635_v25  ;;  %v2645_v19 = vpack.c.bf16 %v4574_v29, %v4573_v12  ;;  %v2647_v25 = vpack.c.bf16 %v4578_v26, %v4577_v1 }
 0x4a1   : > { %2661 = vmatprep.subr.bf16.mxu1 %v3047_v15 }
 0x4a3   : > { %2638 = vmatpush3.bf16.msra.mxu0 %v2637_v24  ;;  %v2649_v24 = vpack.c.bf16 %v4580_v16, %v4579_v8 }
 0x4a4   : > { %2663 = vmatpush3.bf16.msra.mxu1 %v2662_v17  ;;  %2640 = vmatprep.subr.bf16.mxu0 %v2639_v14  ;;  %v2671_v17 = vpack.c.bf16 %v4576_v28, %v4575_v4  ;;  %v2651_v14 = vpack.c.bf16 %v4584_v0, %v4583_v7 }
 0x4a5   : > { %2664 = vmatprep.subr.bf16.mxu1 %v3047_v15 }
 0x4a7   : > { %2642 = vmatpush3.bf16.msra.mxu0 %v2641_v3  ;;  %v2653_v3 = vpack.c.bf16 %v4586_v27, %v4585_v5 }
 0x4a8   : > { %2666 = vmatpush3.bf16.msra.mxu1 %v2665_v23  ;;  %2644 = vmatprep.subr.bf16.mxu0 %v2643_v20  ;;  %v2674_v23 = vpack.c.bf16 %v4582_v22, %v4581_v2 }
 0x4a9   : > { %2667 = vmatprep.subr.bf16.mxu1 %v3047_v15 }
 0x4ab   : > { %2646 = vmatpush3.bf16.msra.mxu0 %v2645_v19 }
 0x4ac   : > { %2669 = vmatpush3.bf16.msra.mxu1 %v2668_v21  ;;  %2648 = vmatprep.subr.bf16.mxu0 %v2647_v25  ;;  %v4587_v21 = vld [vmem:[#allocation249_spill] sm:$0xff] }
 0x4ad   : > { %2670 = vmatprep.subr.bf16.mxu1 %v3047_v15  ;;  %v2677_v10 = vpack.c.bf16 %v4588_v18, %v4587_v21 }
 0x4af   : > { %2650 = vmatpush3.bf16.msra.mxu0 %v2649_v24 }
 0x4b0   : > { %2672 = vmatpush3.bf16.msra.mxu1 %v2671_v17  ;;  %2652 = vmatprep.subr.bf16.mxu0 %v2651_v14 }
 0x4b1   : > { %2673 = vmatprep.subr.bf16.mxu1 %v3047_v15 }
 0x4b3   : > { %2654 = vmatpush3.bf16.msra.mxu0 %v2653_v3 }
 0x4b4   : > { %2675 = vmatpush3.bf16.msra.mxu1 %v2674_v23 }
 0x4b5   : > { %2676 = vmatprep.subr.bf16.mxu1 %v3047_v15 }
 0x4b8   : > { %2678 = vmatpush3.bf16.msra.mxu1 %v2677_v10 }
 0x55c   : > { %v1518_v20 = vpop.f32.mrb[10].mxu0 }
 0x55d   : > { %v1520_v12 = vpop.f32.mrb[11].mxu0 }
 0x560   : > { %v1666_v29 = vpop.f32.mrb[12].mxu0 }
 0x561   : > { %v1592_v19 = vpop.f32.mrb[10].mxu1  ;;  %v2060_v4 = vrot.slane %v1666_v29, 6  ;;  %v1668_v28 = vpop.f32.mrb[13].mxu0 }
 0x562   : > { %v2057_v17 = vrot.slane %v1592_v19, 7  ;;  %v1594_v1 = vpop.f32.mrb[11].mxu1  ;;  %v2080_v15 = vrot.slane %v1668_v28, 6 }
 0x563   : > { %v2078_v26 = vrot.slane %v1594_v1, 7 }
 0x564   : > { %v2059_v25 = vsel %vm2058_vm3, %v2057_v17, %v1518_v20 }
 0x565   : > { %v2062_v8 = vsel %vm2061_vm4, %v2060_v4, %v2059_v25  ;;  %v2079_v16 = vsel %vm2058_vm3, %v2078_v26, %v1520_v12  ;;  %v1814_v24 = vpop.f32.mrb[14].mxu0 }
 0x566   : > { %v2081_v2 = vsel %vm2061_vm4, %v2080_v15, %v2079_v16  ;;  %v1740_v22 = vpop.f32.mrb[12].mxu1  ;;  %v2066_v23 = vrot.slane %v1814_v24, 4  ;;  %v1816_v7 = vpop.f32.mrb[15].mxu0 }
 0x567   : > { %v2063_v0 = vrot.slane %v1740_v22, 5  ;;  %v1742_v14 = vpop.f32.mrb[13].mxu1  ;;  %v2084_v5 = vrot.slane %v1816_v7, 4 }
 0x568   : > { %v2082_v27 = vrot.slane %v1742_v14, 5 }
 0x569   : > { %v2065_v3 = vsel %vm2064_vm5, %v2063_v0, %v2062_v8  ;;  %v1962_v21 = vpop.f32.mrb[16].mxu0 }
 0x56a   : > { %v2068_v18 = vsel %vm2067_vm6, %v2066_v23, %v2065_v3  ;;  %v2083_v10 = vsel %vm2064_vm5, %v2082_v27, %v2081_v2  ;;  %v1888_v29 = vpop.f32.mrb[14].mxu1  ;;  %v2072_v20 = vrot.slane %v1962_v21, 2  ;;  %v1964_v19 = vpop.f32.mrb[17].mxu0 }
 0x56b   : > { %v2085_v12 = vsel %vm2067_vm6, %v2084_v5, %v2083_v10  ;;  %v2069_v4 = vrot.slane %v1888_v29, 3  ;;  %v1890_v28 = vpop.f32.mrb[15].mxu1  ;;  %v2088_v17 = vrot.slane %v1964_v19, 2 }
 0x56c   : > { %v2086_v1 = vrot.slane %v1890_v28, 3 }
 0x56d   : > { %v2071_v15 = vsel %vm2070_vm7, %v2069_v4, %v2068_v18 }
 0x56e   : > { %v2087_v26 = vsel %vm2070_vm7, %v2086_v1, %v2085_v12  ;;  %v2036_v25 = vpop.f32.mrb[16].mxu1  ;;  %v2074_v16 = vsel %vm2073_vm8, %v2072_v20, %v2071_v15 }
 0x56f   : > { %v2089_v24 = vsel %vm2073_vm8, %v2088_v17, %v2087_v26  ;;  %v2075_v8 = vrot.slane %v2036_v25, 1  ;;  %v2038_v22 = vpop.f32.mrb[17].mxu1 }
 0x570   : > { %v2090_v2 = vrot.slane %v2038_v22, 1 }
 0x571   : > { %v2077_v23 = vsel %vm2076_vm9, %v2075_v8, %v2074_v16 }
 0x572   : > { %2158 = vmatprep.mubr.f32.mxu0 %v2077_v23  ;;  %v2091_v7 = vsel %vm2076_vm9, %v2090_v2, %v2089_v24 }
 0x573   : > { %2159 = vmatmul.mubr.f32.vlgmr.msra.gmra.mrb[18].mxu0 %v3964_v11  ;;  %2429 = vmatmul.mubr.f32.vlgmr.msra.gmra.mrb[18].mxu1 %v2091_v7 }
 0x646   : > { %v2336_v0 = vpop.f32.mrb[18].mxu0  ;;  %v2230_v14 = vpop.f32.mrb[18].mxu1 }
 0x647   : > { %v2337_v5 = vpop.f32.mrb[19].mxu0  ;;  %v2430_v27 = vpop.f32.mrb[19].mxu1 }
 0x648   : > { %v2338_v3 = vadd.f32 %v2337_v5, %v2336_v0 }
 0x64a   : > { %v2231_v21 = vadd.f32 %v2338_v3, %v2230_v14 }
 0x64c   : > { %2786 = vtanh.f32 %v2231_v21 }
 0x651   :  { %404 = sbr.rel (!%p402_p8) target bundleno = 273 (0x111), region = 93 }
 0x656   : > { %v2787_v17 = vpop.eup %2786  }
 0x657   : > { %2236 = vst [vmem:[%s2235_s2] sm:$0xff] %v2787_v17 }
 0x658   :  { %2975 = shalt.err (!%p2972_p13)
}
 0x659   :  { %s2976_s20 = scalar_lea.hbm %s4126_s8, 640 }
 0x65a   :  { %p2977_p0 = scmp.ne.s32.totalorder %s4126_s8, %s2976_s20  ;;  %p2980_p1 = scmp.lt.u32.totalorder %s2976_s20, %s4126_s8 }
 0x65c   :  { %p2982_p2 = pnand %p2980_p1, %p2977_p0 }
 0x65e   :  { %2985 = shalt.err (!%p2982_p2)
}
 0x65f   :  { %2248 = dma.vmem_to_hbm [thread:$0]  %s2243_s14, 640, %s4126_s8, [#allocation4], %s3032_s17, %s3032_s17, %s3033_s18  }
 0x660   :  { %3012 = dma.done.wait [#allocation4], 640  }
 0x661   :  { %3013 = vsyncadd [#allocation4], 4294966656 }
 0x662   :  { %2252 = vsyncpa [#allocation3], 1 }
 0x663   :  { %2253 = vsyncpa [#allocation6], 1 }
 0x664   :  { %2254 = vsyncpa [#allocation9], 1 }
 0x665   :  { %2255 = vsyncpa [#allocation12], 1 }
 0x666   :  { %2256 = vsyncpa [#allocation15], 1 }
 0x667   :  { %2257 = vsyncpa [#allocation4], 1 }

</bundles_post_ra>
